<compile_context>
chip_gen: v7x
topology: tpu7x:2x2x1
jax: 0.10.0
libtpu: 0.0.40
codegen_flags: <defaults>
</compile_context>

<pallas_src>
import functools

import jax
import jax.numpy as jnp
import numpy as np
from jax import lax
from jax.experimental import pallas as pl
from jax.experimental.pallas import tpu as pltpu

BN_EPS = 1e-5
F = 128  # padded feature width (lane-dense)


def tabular_kernel(x_ref, w_ref, p_ref, o_ref, *, hid_dim):
    """x_ref: (B,F) f32 padded input.
       w_ref: (7,F,F) bf16 padded weights [w1..w5 trunk, w6, w7 head].
       p_ref: (12,F) f32 packed params: rows 0-4 gamma1..5, 5-9 beta1..5,
              row 10 b6, row 11 b7.
       o_ref: (B,F) f32 padded output (first head_dim lanes valid)."""

    def bf16(a):
        # Cast only the MXU operands; keep all elementwise math in f32.
        return a.astype(jnp.bfloat16)

    def bn_train(h, layer):
        g = p_ref[layer:layer + 1, :]          # (1,F)
        be = p_ref[5 + layer:6 + layer, :]     # (1,F)
        # Single-pass batch stats (biased variance, PyTorch training mode).
        mu = jnp.mean(h, axis=0, keepdims=True)
        msq = jnp.mean(h * h, axis=0, keepdims=True)
        var = jnp.maximum(msq - mu * mu, 0.0)  # clamp: f32 cancellation safety
        scale = g * lax.rsqrt(var + BN_EPS)
        shift = be - mu * scale
        return h * scale + shift               # one FMA per element

    h = x_ref[...]
    for layer in range(5):
        # Pre-BN linear biases omitted: mean subtraction cancels them exactly.
        h = jnp.dot(bf16(h), w_ref[layer], preferred_element_type=jnp.float32)
        h = bn_train(h, layer)
        if layer < 4:
            h = jnp.maximum(h, 0.0)

    # Maxout over pool=4 contiguous slabs of width hid (layer-5 columns were
    # permuted in the wrapper).  log2(pool) static cyclic rotate + max.
    m = jnp.maximum(h, jnp.roll(h, 2 * hid_dim, axis=1))
    m = jnp.maximum(m, jnp.roll(m, hid_dim, axis=1))
    # Lanes [0,hid) of m hold the maxout result; lanes >= hid hold partial
    # maxes that are annihilated by w6's zero-padded rows.

    # Projection head: Linear -> ReLU -> Linear (lane-dense (B,F) output).
    z = jnp.maximum(
        jnp.dot(bf16(m), w_ref[5], preferred_element_type=jnp.float32)
        + p_ref[10:11, :], 0.0)
    o_ref[...] = (jnp.dot(bf16(z), w_ref[6], preferred_element_type=jnp.float32)
                  + p_ref[11:12, :])


def tabular_forward(x_pad, weights, params, hid_dim, head_dim):
    B = x_pad.shape[0]
    vmem = pl.BlockSpec(memory_space=pltpu.MemorySpace.VMEM)
    out = pl.pallas_call(
        functools.partial(tabular_kernel, hid_dim=hid_dim),
        out_shape=jax.ShapeDtypeStruct((B, F), jnp.float32),
        in_specs=[vmem, vmem, vmem],
        out_specs=vmem,
        # Tiny footprint; well under scoped VMEM on v5e/v6e/v7x.
        compiler_params=pltpu.CompilerParams(vmem_limit_bytes=32 * 1024 * 1024),
    )(x_pad, weights, params)
    return out[:, :head_dim]


def init_params(key, input_dim, hid_dim, head_dim):
    """Deterministic synthetic parameters (shapes follow TabulerModel.__init__)."""
    trunk_dims = [(input_dim, hid_dim),
                  (hid_dim, hid_dim),
                  (hid_dim, 2 * hid_dim),
                  (2 * hid_dim, 2 * hid_dim),
                  (2 * hid_dim, 4 * hid_dim)]
    keys = jax.random.split(key, 4 * len(trunk_dims) + 4)
    ki = iter(range(len(keys)))

    trunk = []
    for (din, dout) in trunk_dims:
        w = jax.random.normal(keys[next(ki)], (din, dout), jnp.float32) * 0.1
        b = jax.random.normal(keys[next(ki)], (1, dout), jnp.float32) * 0.1
        g = 1.0 + 0.1 * jax.random.normal(keys[next(ki)], (1, dout), jnp.float32)
        be = 0.1 * jax.random.normal(keys[next(ki)], (1, dout), jnp.float32)
        trunk.append((w, b, g, be))

    w6 = jax.random.normal(keys[next(ki)], (hid_dim, hid_dim), jnp.float32) * 0.1
    b6 = jax.random.normal(keys[next(ki)], (1, hid_dim), jnp.float32) * 0.1
    w7 = jax.random.normal(keys[next(ki)], (hid_dim, head_dim), jnp.float32) * 0.1
    b7 = jax.random.normal(keys[next(ki)], (1, head_dim), jnp.float32) * 0.1
    return trunk, (w6, b6, w7, b7)


def pack_inputs(x, trunk, head, hid_dim, pool_size):
    """Permute layer-5 columns for contiguous maxout slabs, pad every feature
    dim to F=128 lanes, and pack weights (bf16) / 1-D params (f32)."""
    # The rotate-max maxout is only exact when the maxout input fills all lanes.
    assert pool_size * hid_dim == F, "pool_size * hid_dim must equal 128"

    def pad_mat(w):
        out = np.zeros((F, F), np.float32)
        w = np.asarray(w)
        out[:w.shape[0], :w.shape[1]] = w
        return out

    def pad_vec(v):
        out = np.zeros((F,), np.float32)
        v = np.asarray(v).reshape(-1)
        out[:v.shape[0]] = v
        return out

    # Permutation: kernel column c <- PyTorch column (c % hid)*pool + c//hid,
    # so maxout group member k occupies the slab [k*hid, (k+1)*hid).
    w5, _, g5, be5 = trunk[-1]
    width = pool_size * hid_dim
    idx = (np.arange(width) % hid_dim) * pool_size + (np.arange(width) // hid_dim)
    trunk_k = list(trunk[:-1]) + [(np.asarray(w5)[:, idx], None,
                                   np.asarray(g5)[:, idx], np.asarray(be5)[:, idx])]

    w6, b6, w7, b7 = head
    weights_np = np.stack([pad_mat(w) for (w, _, _, _) in trunk_k]
                          + [pad_mat(w6), pad_mat(w7)])        # (7, F, F)
    params_np = np.stack([pad_vec(g) for (_, _, g, _) in trunk_k]
                         + [pad_vec(be) for (_, _, _, be) in trunk_k]
                         + [pad_vec(b6), pad_vec(b7)])         # (12, F)

    x = np.asarray(x)
    x_pad = np.zeros((x.shape[0], F), np.float32)
    x_pad[:, :x.shape[1]] = x
    return (jnp.asarray(x_pad),
            jnp.asarray(weights_np, dtype=jnp.bfloat16),       # bf16 MXU operands
            jnp.asarray(params_np))


def reference_forward(x, trunk, head, pool_size):
    """Pure-JAX mirror of the PyTorch forward (training-mode BatchNorm), using
    the same bf16-operand / f32-accumulation matmul convention as the kernel.
    It keeps the b1..b5 biases the kernel drops (they cancel through BN)."""
    def mm(a, b):
        return jnp.dot(a.astype(jnp.bfloat16), b.astype(jnp.bfloat16),
                       preferred_element_type=jnp.float32)

    h = x
    for i, (w, b, g, be) in enumerate(trunk):
        h = mm(h, w) + b
        mu = h.mean(0, keepdims=True)
        var = ((h - mu) ** 2).mean(0, keepdims=True)
        h = (h - mu) / jnp.sqrt(var + BN_EPS) * g + be
        if i < len(trunk) - 1:
            h = jnp.maximum(h, 0.0)
    B, D = h.shape
    m = h.reshape(B, D // pool_size, pool_size).max(-1)   # Maxout (contiguous groups)
    w6, b6, w7, b7 = head
    z = jnp.maximum(mm(m, w6) + b6, 0.0)
    return mm(z, w7) + b7


if __name__ == "__main__":
    # pool_size must equal 4 so that maxout(4*hid) -> hid feeds projectHead,
    # and pool_size*hid_dim == 128 so the maxout input is exactly lane-dense.
    # num_classes is unused in forward.
    B, input_dim, hid_dim, head_dim, pool_size = 64, 16, 32, 16, 4

    key = jax.random.PRNGKey(0)
    kx, kp = jax.random.split(key)
    x = jax.random.normal(kx, (B, input_dim), jnp.float32)

    trunk, head = init_params(kp, input_dim, hid_dim, head_dim)
    x_pad, weights, params = pack_inputs(x, trunk, head, hid_dim, pool_size)

    out = tabular_forward(x_pad, weights, params, hid_dim, head_dim)
    out = jax.block_until_ready(out)

    ref = reference_forward(x, trunk, head, pool_size)
    np.testing.assert_allclose(np.asarray(out), np.asarray(ref),
                               rtol=5e-3, atol=5e-3)

    print("KERNEL_OK")
</pallas_src>

<mosaic_0001>
module attributes {stable_mosaic.version = 11 : i64} {
  func.func @tabular_kernel(%arg0: memref<64x128xf32, #tpu.memory_space<vmem>>, %arg1: memref<7x128x128xbf16, #tpu.memory_space<vmem>>, %arg2: memref<12x128xf32, #tpu.memory_space<vmem>>, %arg3: memref<64x128xf32, #tpu.memory_space<vmem>>) attributes {dimension_semantics = [], scalar_prefetch = 0 : i64, scratch_operands = 0 : i64, tpu.core_type = #tpu.core_type<tc>} {
    %c0 = arith.constant 0 : index
    %c0_0 = arith.constant 0 : index
    %0 = vector.load %arg0[%c0, %c0_0] : memref<64x128xf32, #tpu.memory_space<vmem>>, vector<64x128xf32>
    %1 = arith.truncf %0 : vector<64x128xf32> to vector<64x128xbf16>
    %c0_1 = arith.constant 0 : index
    %c0_2 = arith.constant 0 : index
    %c0_3 = arith.constant 0 : index
    %2 = vector.load %arg1[%c0_1, %c0_2, %c0_3] : memref<7x128x128xbf16, #tpu.memory_space<vmem>>, vector<1x128x128xbf16>
    %3 = vector.shape_cast %2 : vector<1x128x128xbf16> to vector<128x128xbf16>
    %cst = arith.constant dense<0.000000e+00> : vector<64x128xf32>
    %4 = tpu.matmul %1, %3, %cst {dimension_numbers = #tpu.dot_dimension_numbers<[1], [0], [0], [1], [0, 0, 1, 1], [], []>} : vector<64x128xbf16>, vector<128x128xbf16>, vector<64x128xf32> -> vector<64x128xf32>
    %c0_4 = arith.constant 0 : index
    %c0_5 = arith.constant 0 : index
    %5 = vector.load %arg2[%c0_4, %c0_5] : memref<12x128xf32, #tpu.memory_space<vmem>>, vector<1x128xf32>
    %c5 = arith.constant 5 : index
    %c0_6 = arith.constant 0 : index
    %6 = vector.load %arg2[%c5, %c0_6] : memref<12x128xf32, #tpu.memory_space<vmem>>, vector<1x128xf32>
    %cst_7 = arith.constant dense<0.000000e+00> : vector<128xf32>
    %7 = vector.multi_reduction <add>, %4, %cst_7 [0] : vector<64x128xf32> to vector<128xf32>
    %8 = vector.shape_cast %7 : vector<128xf32> to vector<1x128xf32>
    %cst_8 = arith.constant 6.400000e+01 : f32
    %9 = vector.broadcast %cst_8 : f32 to vector<1x128xf32>
    %10 = arith.divf %8, %9 : vector<1x128xf32>
    %11 = arith.mulf %4, %4 : vector<64x128xf32>
    %cst_9 = arith.constant dense<0.000000e+00> : vector<128xf32>
    %12 = vector.multi_reduction <add>, %11, %cst_9 [0] : vector<64x128xf32> to vector<128xf32>
    %13 = vector.shape_cast %12 : vector<128xf32> to vector<1x128xf32>
    %cst_10 = arith.constant 6.400000e+01 : f32
    %14 = vector.broadcast %cst_10 : f32 to vector<1x128xf32>
    %15 = arith.divf %13, %14 : vector<1x128xf32>
    %16 = arith.mulf %10, %10 : vector<1x128xf32>
    %17 = arith.subf %15, %16 : vector<1x128xf32>
    %cst_11 = arith.constant 0.000000e+00 : f32
    %18 = vector.broadcast %cst_11 : f32 to vector<1x128xf32>
    %19 = arith.maximumf %17, %18 : vector<1x128xf32>
    %cst_12 = arith.constant 9.99999974E-6 : f32
    %20 = vector.broadcast %cst_12 : f32 to vector<1x128xf32>
    %21 = arith.addf %19, %20 : vector<1x128xf32>
    %22 = math.rsqrt %21 : vector<1x128xf32>
    %23 = arith.mulf %5, %22 : vector<1x128xf32>
    %24 = arith.mulf %10, %23 : vector<1x128xf32>
    %25 = arith.subf %6, %24 : vector<1x128xf32>
    %26 = vector.broadcast %23 : vector<1x128xf32> to vector<64x128xf32>
    %27 = arith.mulf %4, %26 : vector<64x128xf32>
    %28 = vector.broadcast %25 : vector<1x128xf32> to vector<64x128xf32>
    %29 = arith.addf %27, %28 : vector<64x128xf32>
    %cst_13 = arith.constant 0.000000e+00 : f32
    %30 = vector.broadcast %cst_13 : f32 to vector<64x128xf32>
    %31 = arith.maximumf %29, %30 : vector<64x128xf32>
    %32 = arith.truncf %31 : vector<64x128xf32> to vector<64x128xbf16>
    %c1 = arith.constant 1 : index
    %c0_14 = arith.constant 0 : index
    %c0_15 = arith.constant 0 : index
    %33 = vector.load %arg1[%c1, %c0_14, %c0_15] : memref<7x128x128xbf16, #tpu.memory_space<vmem>>, vector<1x128x128xbf16>
    %34 = vector.shape_cast %33 : vector<1x128x128xbf16> to vector<128x128xbf16>
    %cst_16 = arith.constant dense<0.000000e+00> : vector<64x128xf32>
    %35 = tpu.matmul %32, %34, %cst_16 {dimension_numbers = #tpu.dot_dimension_numbers<[1], [0], [0], [1], [0, 0, 1, 1], [], []>} : vector<64x128xbf16>, vector<128x128xbf16>, vector<64x128xf32> -> vector<64x128xf32>
    %c1_17 = arith.constant 1 : index
    %c0_18 = arith.constant 0 : index
    %36 = vector.load %arg2[%c1_17, %c0_18] : memref<12x128xf32, #tpu.memory_space<vmem>>, vector<1x128xf32>
    %c6 = arith.constant 6 : index
    %c0_19 = arith.constant 0 : index
    %37 = vector.load %arg2[%c6, %c0_19] : memref<12x128xf32, #tpu.memory_space<vmem>>, vector<1x128xf32>
    %cst_20 = arith.constant dense<0.000000e+00> : vector<128xf32>
    %38 = vector.multi_reduction <add>, %35, %cst_20 [0] : vector<64x128xf32> to vector<128xf32>
    %39 = vector.shape_cast %38 : vector<128xf32> to vector<1x128xf32>
    %cst_21 = arith.constant 6.400000e+01 : f32
    %40 = vector.broadcast %cst_21 : f32 to vector<1x128xf32>
    %41 = arith.divf %39, %40 : vector<1x128xf32>
    %42 = arith.mulf %35, %35 : vector<64x128xf32>
    %cst_22 = arith.constant dense<0.000000e+00> : vector<128xf32>
    %43 = vector.multi_reduction <add>, %42, %cst_22 [0] : vector<64x128xf32> to vector<128xf32>
    %44 = vector.shape_cast %43 : vector<128xf32> to vector<1x128xf32>
    %cst_23 = arith.constant 6.400000e+01 : f32
    %45 = vector.broadcast %cst_23 : f32 to vector<1x128xf32>
    %46 = arith.divf %44, %45 : vector<1x128xf32>
    %47 = arith.mulf %41, %41 : vector<1x128xf32>
    %48 = arith.subf %46, %47 : vector<1x128xf32>
    %cst_24 = arith.constant 0.000000e+00 : f32
    %49 = vector.broadcast %cst_24 : f32 to vector<1x128xf32>
    %50 = arith.maximumf %48, %49 : vector<1x128xf32>
    %cst_25 = arith.constant 9.99999974E-6 : f32
    %51 = vector.broadcast %cst_25 : f32 to vector<1x128xf32>
    %52 = arith.addf %50, %51 : vector<1x128xf32>
    %53 = math.rsqrt %52 : vector<1x128xf32>
    %54 = arith.mulf %36, %53 : vector<1x128xf32>
    %55 = arith.mulf %41, %54 : vector<1x128xf32>
    %56 = arith.subf %37, %55 : vector<1x128xf32>
    %57 = vector.broadcast %54 : vector<1x128xf32> to vector<64x128xf32>
    %58 = arith.mulf %35, %57 : vector<64x128xf32>
    %59 = vector.broadcast %56 : vector<1x128xf32> to vector<64x128xf32>
    %60 = arith.addf %58, %59 : vector<64x128xf32>
    %cst_26 = arith.constant 0.000000e+00 : f32
    %61 = vector.broadcast %cst_26 : f32 to vector<64x128xf32>
    %62 = arith.maximumf %60, %61 : vector<64x128xf32>
    %63 = arith.truncf %62 : vector<64x128xf32> to vector<64x128xbf16>
    %c2 = arith.constant 2 : index
    %c0_27 = arith.constant 0 : index
    %c0_28 = arith.constant 0 : index
    %64 = vector.load %arg1[%c2, %c0_27, %c0_28] : memref<7x128x128xbf16, #tpu.memory_space<vmem>>, vector<1x128x128xbf16>
    %65 = vector.shape_cast %64 : vector<1x128x128xbf16> to vector<128x128xbf16>
    %cst_29 = arith.constant dense<0.000000e+00> : vector<64x128xf32>
    %66 = tpu.matmul %63, %65, %cst_29 {dimension_numbers = #tpu.dot_dimension_numbers<[1], [0], [0], [1], [0, 0, 1, 1], [], []>} : vector<64x128xbf16>, vector<128x128xbf16>, vector<64x128xf32> -> vector<64x128xf32>
    %c2_30 = arith.constant 2 : index
    %c0_31 = arith.constant 0 : index
    %67 = vector.load %arg2[%c2_30, %c0_31] : memref<12x128xf32, #tpu.memory_space<vmem>>, vector<1x128xf32>
    %c7 = arith.constant 7 : index
    %c0_32 = arith.constant 0 : index
    %68 = vector.load %arg2[%c7, %c0_32] : memref<12x128xf32, #tpu.memory_space<vmem>>, vector<1x128xf32>
    %cst_33 = arith.constant dense<0.000000e+00> : vector<128xf32>
    %69 = vector.multi_reduction <add>, %66, %cst_33 [0] : vector<64x128xf32> to vector<128xf32>
    %70 = vector.shape_cast %69 : vector<128xf32> to vector<1x128xf32>
    %cst_34 = arith.constant 6.400000e+01 : f32
    %71 = vector.broadcast %cst_34 : f32 to vector<1x128xf32>
    %72 = arith.divf %70, %71 : vector<1x128xf32>
    %73 = arith.mulf %66, %66 : vector<64x128xf32>
    %cst_35 = arith.constant dense<0.000000e+00> : vector<128xf32>
    %74 = vector.multi_reduction <add>, %73, %cst_35 [0] : vector<64x128xf32> to vector<128xf32>
    %75 = vector.shape_cast %74 : vector<128xf32> to vector<1x128xf32>
    %cst_36 = arith.constant 6.400000e+01 : f32
    %76 = vector.broadcast %cst_36 : f32 to vector<1x128xf32>
    %77 = arith.divf %75, %76 : vector<1x128xf32>
    %78 = arith.mulf %72, %72 : vector<1x128xf32>
    %79 = arith.subf %77, %78 : vector<1x128xf32>
    %cst_37 = arith.constant 0.000000e+00 : f32
    %80 = vector.broadcast %cst_37 : f32 to vector<1x128xf32>
    %81 = arith.maximumf %79, %80 : vector<1x128xf32>
    %cst_38 = arith.constant 9.99999974E-6 : f32
    %82 = vector.broadcast %cst_38 : f32 to vector<1x128xf32>
    %83 = arith.addf %81, %82 : vector<1x128xf32>
    %84 = math.rsqrt %83 : vector<1x128xf32>
    %85 = arith.mulf %67, %84 : vector<1x128xf32>
    %86 = arith.mulf %72, %85 : vector<1x128xf32>
    %87 = arith.subf %68, %86 : vector<1x128xf32>
    %88 = vector.broadcast %85 : vector<1x128xf32> to vector<64x128xf32>
    %89 = arith.mulf %66, %88 : vector<64x128xf32>
    %90 = vector.broadcast %87 : vector<1x128xf32> to vector<64x128xf32>
    %91 = arith.addf %89, %90 : vector<64x128xf32>
    %cst_39 = arith.constant 0.000000e+00 : f32
    %92 = vector.broadcast %cst_39 : f32 to vector<64x128xf32>
    %93 = arith.maximumf %91, %92 : vector<64x128xf32>
    %94 = arith.truncf %93 : vector<64x128xf32> to vector<64x128xbf16>
    %c3 = arith.constant 3 : index
    %c0_40 = arith.constant 0 : index
    %c0_41 = arith.constant 0 : index
    %95 = vector.load %arg1[%c3, %c0_40, %c0_41] : memref<7x128x128xbf16, #tpu.memory_space<vmem>>, vector<1x128x128xbf16>
    %96 = vector.shape_cast %95 : vector<1x128x128xbf16> to vector<128x128xbf16>
    %cst_42 = arith.constant dense<0.000000e+00> : vector<64x128xf32>
    %97 = tpu.matmul %94, %96, %cst_42 {dimension_numbers = #tpu.dot_dimension_numbers<[1], [0], [0], [1], [0, 0, 1, 1], [], []>} : vector<64x128xbf16>, vector<128x128xbf16>, vector<64x128xf32> -> vector<64x128xf32>
    %c3_43 = arith.constant 3 : index
    %c0_44 = arith.constant 0 : index
    %98 = vector.load %arg2[%c3_43, %c0_44] : memref<12x128xf32, #tpu.memory_space<vmem>>, vector<1x128xf32>
    %c8 = arith.constant 8 : index
    %c0_45 = arith.constant 0 : index
    %99 = vector.load %arg2[%c8, %c0_45] : memref<12x128xf32, #tpu.memory_space<vmem>>, vector<1x128xf32>
    %cst_46 = arith.constant dense<0.000000e+00> : vector<128xf32>
    %100 = vector.multi_reduction <add>, %97, %cst_46 [0] : vector<64x128xf32> to vector<128xf32>
    %101 = vector.shape_cast %100 : vector<128xf32> to vector<1x128xf32>
    %cst_47 = arith.constant 6.400000e+01 : f32
    %102 = vector.broadcast %cst_47 : f32 to vector<1x128xf32>
    %103 = arith.divf %101, %102 : vector<1x128xf32>
    %104 = arith.mulf %97, %97 : vector<64x128xf32>
    %cst_48 = arith.constant dense<0.000000e+00> : vector<128xf32>
    %105 = vector.multi_reduction <add>, %104, %cst_48 [0] : vector<64x128xf32> to vector<128xf32>
    %106 = vector.shape_cast %105 : vector<128xf32> to vector<1x128xf32>
    %cst_49 = arith.constant 6.400000e+01 : f32
    %107 = vector.broadcast %cst_49 : f32 to vector<1x128xf32>
    %108 = arith.divf %106, %107 : vector<1x128xf32>
    %109 = arith.mulf %103, %103 : vector<1x128xf32>
    %110 = arith.subf %108, %109 : vector<1x128xf32>
    %cst_50 = arith.constant 0.000000e+00 : f32
    %111 = vector.broadcast %cst_50 : f32 to vector<1x128xf32>
    %112 = arith.maximumf %110, %111 : vector<1x128xf32>
    %cst_51 = arith.constant 9.99999974E-6 : f32
    %113 = vector.broadcast %cst_51 : f32 to vector<1x128xf32>
    %114 = arith.addf %112, %113 : vector<1x128xf32>
    %115 = math.rsqrt %114 : vector<1x128xf32>
    %116 = arith.mulf %98, %115 : vector<1x128xf32>
    %117 = arith.mulf %103, %116 : vector<1x128xf32>
    %118 = arith.subf %99, %117 : vector<1x128xf32>
    %119 = vector.broadcast %116 : vector<1x128xf32> to vector<64x128xf32>
    %120 = arith.mulf %97, %119 : vector<64x128xf32>
    %121 = vector.broadcast %118 : vector<1x128xf32> to vector<64x128xf32>
    %122 = arith.addf %120, %121 : vector<64x128xf32>
    %cst_52 = arith.constant 0.000000e+00 : f32
    %123 = vector.broadcast %cst_52 : f32 to vector<64x128xf32>
    %124 = arith.maximumf %122, %123 : vector<64x128xf32>
    %125 = arith.truncf %124 : vector<64x128xf32> to vector<64x128xbf16>
    %c4 = arith.constant 4 : index
    %c0_53 = arith.constant 0 : index
    %c0_54 = arith.constant 0 : index
    %126 = vector.load %arg1[%c4, %c0_53, %c0_54] : memref<7x128x128xbf16, #tpu.memory_space<vmem>>, vector<1x128x128xbf16>
    %127 = vector.shape_cast %126 : vector<1x128x128xbf16> to vector<128x128xbf16>
    %cst_55 = arith.constant dense<0.000000e+00> : vector<64x128xf32>
    %128 = tpu.matmul %125, %127, %cst_55 {dimension_numbers = #tpu.dot_dimension_numbers<[1], [0], [0], [1], [0, 0, 1, 1], [], []>} : vector<64x128xbf16>, vector<128x128xbf16>, vector<64x128xf32> -> vector<64x128xf32>
    %c4_56 = arith.constant 4 : index
    %c0_57 = arith.constant 0 : index
    %129 = vector.load %arg2[%c4_56, %c0_57] : memref<12x128xf32, #tpu.memory_space<vmem>>, vector<1x128xf32>
    %c9 = arith.constant 9 : index
    %c0_58 = arith.constant 0 : index
    %130 = vector.load %arg2[%c9, %c0_58] : memref<12x128xf32, #tpu.memory_space<vmem>>, vector<1x128xf32>
    %cst_59 = arith.constant dense<0.000000e+00> : vector<128xf32>
    %131 = vector.multi_reduction <add>, %128, %cst_59 [0] : vector<64x128xf32> to vector<128xf32>
    %132 = vector.shape_cast %131 : vector<128xf32> to vector<1x128xf32>
    %cst_60 = arith.constant 6.400000e+01 : f32
    %133 = vector.broadcast %cst_60 : f32 to vector<1x128xf32>
    %134 = arith.divf %132, %133 : vector<1x128xf32>
    %135 = arith.mulf %128, %128 : vector<64x128xf32>
    %cst_61 = arith.constant dense<0.000000e+00> : vector<128xf32>
    %136 = vector.multi_reduction <add>, %135, %cst_61 [0] : vector<64x128xf32> to vector<128xf32>
    %137 = vector.shape_cast %136 : vector<128xf32> to vector<1x128xf32>
    %cst_62 = arith.constant 6.400000e+01 : f32
    %138 = vector.broadcast %cst_62 : f32 to vector<1x128xf32>
    %139 = arith.divf %137, %138 : vector<1x128xf32>
    %140 = arith.mulf %134, %134 : vector<1x128xf32>
    %141 = arith.subf %139, %140 : vector<1x128xf32>
    %cst_63 = arith.constant 0.000000e+00 : f32
    %142 = vector.broadcast %cst_63 : f32 to vector<1x128xf32>
    %143 = arith.maximumf %141, %142 : vector<1x128xf32>
    %cst_64 = arith.constant 9.99999974E-6 : f32
    %144 = vector.broadcast %cst_64 : f32 to vector<1x128xf32>
    %145 = arith.addf %143, %144 : vector<1x128xf32>
    %146 = math.rsqrt %145 : vector<1x128xf32>
    %147 = arith.mulf %129, %146 : vector<1x128xf32>
    %148 = arith.mulf %134, %147 : vector<1x128xf32>
    %149 = arith.subf %130, %148 : vector<1x128xf32>
    %150 = vector.broadcast %147 : vector<1x128xf32> to vector<64x128xf32>
    %151 = arith.mulf %128, %150 : vector<64x128xf32>
    %152 = vector.broadcast %149 : vector<1x128xf32> to vector<64x128xf32>
    %153 = arith.addf %151, %152 : vector<64x128xf32>
    %154 = vector.extract_strided_slice %153 {offsets = [0, 64], sizes = [64, 64], strides = [1, 1]} : vector<64x128xf32> to vector<64x64xf32>
    %155 = vector.extract_strided_slice %153 {offsets = [0, 0], sizes = [64, 64], strides = [1, 1]} : vector<64x128xf32> to vector<64x64xf32>
    %156 = tpu.concatenate %154, %155 in 1 : vector<64x64xf32>, vector<64x64xf32> -> vector<64x128xf32>
    %157 = arith.maximumf %153, %156 : vector<64x128xf32>
    %158 = vector.extract_strided_slice %157 {offsets = [0, 96], sizes = [64, 32], strides = [1, 1]} : vector<64x128xf32> to vector<64x32xf32>
    %159 = vector.extract_strided_slice %157 {offsets = [0, 0], sizes = [64, 96], strides = [1, 1]} : vector<64x128xf32> to vector<64x96xf32>
    %160 = tpu.concatenate %158, %159 in 1 : vector<64x32xf32>, vector<64x96xf32> -> vector<64x128xf32>
    %161 = arith.maximumf %157, %160 : vector<64x128xf32>
    %162 = arith.truncf %161 : vector<64x128xf32> to vector<64x128xbf16>
    %c5_65 = arith.constant 5 : index
    %c0_66 = arith.constant 0 : index
    %c0_67 = arith.constant 0 : index
    %163 = vector.load %arg1[%c5_65, %c0_66, %c0_67] : memref<7x128x128xbf16, #tpu.memory_space<vmem>>, vector<1x128x128xbf16>
    %164 = vector.shape_cast %163 : vector<1x128x128xbf16> to vector<128x128xbf16>
    %cst_68 = arith.constant dense<0.000000e+00> : vector<64x128xf32>
    %165 = tpu.matmul %162, %164, %cst_68 {dimension_numbers = #tpu.dot_dimension_numbers<[1], [0], [0], [1], [0, 0, 1, 1], [], []>} : vector<64x128xbf16>, vector<128x128xbf16>, vector<64x128xf32> -> vector<64x128xf32>
    %c10 = arith.constant 10 : index
    %c0_69 = arith.constant 0 : index
    %166 = vector.load %arg2[%c10, %c0_69] : memref<12x128xf32, #tpu.memory_space<vmem>>, vector<1x128xf32>
    %167 = vector.broadcast %166 : vector<1x128xf32> to vector<64x128xf32>
    %168 = arith.addf %165, %167 : vector<64x128xf32>
    %cst_70 = arith.constant 0.000000e+00 : f32
    %169 = vector.broadcast %cst_70 : f32 to vector<64x128xf32>
    %170 = arith.maximumf %168, %169 : vector<64x128xf32>
    %171 = arith.truncf %170 : vector<64x128xf32> to vector<64x128xbf16>
    %c6_71 = arith.constant 6 : index
    %c0_72 = arith.constant 0 : index
    %c0_73 = arith.constant 0 : index
    %172 = vector.load %arg1[%c6_71, %c0_72, %c0_73] : memref<7x128x128xbf16, #tpu.memory_space<vmem>>, vector<1x128x128xbf16>
    %173 = vector.shape_cast %172 : vector<1x128x128xbf16> to vector<128x128xbf16>
    %cst_74 = arith.constant dense<0.000000e+00> : vector<64x128xf32>
    %174 = tpu.matmul %171, %173, %cst_74 {dimension_numbers = #tpu.dot_dimension_numbers<[1], [0], [0], [1], [0, 0, 1, 1], [], []>} : vector<64x128xbf16>, vector<128x128xbf16>, vector<64x128xf32> -> vector<64x128xf32>
    %c11 = arith.constant 11 : index
    %c0_75 = arith.constant 0 : index
    %175 = vector.load %arg2[%c11, %c0_75] : memref<12x128xf32, #tpu.memory_space<vmem>>, vector<1x128xf32>
    %176 = vector.broadcast %175 : vector<1x128xf32> to vector<64x128xf32>
    %177 = arith.addf %174, %176 : vector<64x128xf32>
    %c0_76 = arith.constant 0 : index
    %c0_77 = arith.constant 0 : index
    %178 = vector.load %arg3[%c0_76, %c0_77] : memref<64x128xf32, #tpu.memory_space<vmem>>, vector<64x128xf32>
    tpu.vector_store %arg3[%c0_76, %c0_77], %177 {strides = array<i32>} : memref<64x128xf32, #tpu.memory_space<vmem>>, vector<64x128xf32>,
    return
  }
}

</mosaic_0001>

<bundles_post_ra>
// kernel: tpu_custom_call.1
= control target key start
LH: loop header
LB: loop body
LE: loop exit
PB: predicated region body
PF: predicated region fallthrough
CT: control target
= control target key end

     0   :  { %8 = vsyncpa [#allocation3], 0  ;;  %s2148_s0 = inlined_call_operand.hbm [shape: f32[64,128], index: 0, kind: input, shape index: {}]   ;;  %s2149_s1 = inlined_call_operand.hbm [shape: bf16[7,128,128], index: 1, kind: input, shape index: {}]   ;;  %s2150_s2 = inlined_call_operand.hbm [shape: f32[12,128], index: 2, kind: input, shape index: {}]   ;;  %s2151_s3 = inlined_call_operand.hbm [shape: f32[64,128], index: 3, kind: output, shape index: {}]  }
   0x1   :  { %9 = vsyncpa [#allocation6], 0 }
   0x2   :  { %10 = vsyncpa [#allocation4], 0  ;;  %s2044_s12 = smov [#allocation5]   ;;  %s1950_s16 = scalar_lea.hbm %s2149_s1, 7168 }
   0x3   :  { %s28_s13 = sshll.u32 %s2044_s12, 4  ;;  %p1951_p0 = scmp.ne.s32.totalorder %s2149_s1, %s1950_s16  ;;  %s29_s13 = int_to_ptr.vmem [resolvable:$true] %s28_s13 }
   0x4   :  { %p1954_p1 = scmp.lt.u32.totalorder %s1950_s16, %s2149_s1 }
   0x6   :  { %p1956_p2 = pnand %p1954_p1, %p1951_p0 }
   0x8   :  { %1959 = shalt.err (!%p1956_p2)
}
   0x9   :  { %s1960_s21 = scalar_lea.vmem %s29_s13, 7168  ;;  %p1965_p4 = scmp.lt.s32.totalorder %s29_s13, %s29_s13 }
   0xa   :  { %p1961_p3 = scmp.ne.s32.totalorder %s29_s13, %s1960_s21  ;;  %p1966_p5 = scmp.lt.s32.totalorder %s1960_s21, %s1960_s21 }
   0xc   :  { %p1967_p6 = por %p1966_p5, %p1965_p4 }
   0xe   :  { %p1968_p7 = pnand %p1967_p6, %p1961_p3 }
  0x10   :  { %1971 = shalt.err (!%p1968_p7)
}
  0x11   :  { %s2045_s22 = smov 64   ;;  %s2046_s23 = smov 4  }
  0x12   :  { %34 = dma.hbm_to_vmem [thread:$0]  %s2149_s1, 7168, %s29_s13, [#allocation6], %s2045_s22, %s2045_s22, %s2046_s23  }
  0x13   :  { %s2047_s26 = smov [#allocation2]   ;;  %s1972_s30 = scalar_lea.hbm %s2148_s0, 1024 }
  0x14   :  { %s16_s27 = sshll.u32 %s2047_s26, 4  ;;  %p1973_p8 = scmp.ne.s32.totalorder %s2148_s0, %s1972_s30  ;;  %s17_s27 = int_to_ptr.vmem [resolvable:$true] %s16_s27 }
  0x15   :  { %p1976_p9 = scmp.lt.u32.totalorder %s1972_s30, %s2148_s0 }
  0x17   :  { %p1978_p10 = pnand %p1976_p9, %p1973_p8 }
  0x19   :  { %1981 = shalt.err (!%p1978_p10)
}
  0x1a   :  { %s1982_s8 = scalar_lea.vmem %s17_s27, 1024  ;;  %p1987_p12 = scmp.lt.s32.totalorder %s17_s27, %s17_s27 }
  0x1b   :  { %p1983_p11 = scmp.ne.s32.totalorder %s17_s27, %s1982_s8  ;;  %p1988_p13 = scmp.lt.s32.totalorder %s1982_s8, %s1982_s8 }
  0x1d   :  { %p1989_p0 = por %p1988_p13, %p1987_p12 }
  0x1f   :  { %p1990_p1 = pnand %p1989_p0, %p1983_p11 }
  0x21   :  { %1993 = shalt.err (!%p1990_p1)
}
  0x22   :  { %s2048_s1 = smov 128   ;;  %s2049_s9 = smov 8  }
  0x23   :  { %22 = dma.hbm_to_vmem [thread:$0]  %s2148_s0, 1024, %s17_s27, [#allocation3], %s2048_s1, %s2048_s1, %s2049_s9  }
  0x24   :  { %s2050_s12 = smov [#allocation7]   ;;  %s1994_s16 = scalar_lea.hbm %s2150_s2, 256 }
  0x25   :  { %s40_s13 = sshll.u32 %s2050_s12, 4  ;;  %p1995_p2 = scmp.ne.s32.totalorder %s2150_s2, %s1994_s16  ;;  %s41_s13 = int_to_ptr.vmem [resolvable:$true] %s40_s13 }
  0x26   :  { %p1998_p3 = scmp.lt.u32.totalorder %s1994_s16, %s2150_s2 }
  0x28   :  { %p2000_p4 = pnand %p1998_p3, %p1995_p2 }
  0x2a   :  { %2003 = shalt.err (!%p2000_p4)
}
  0x2b   :  { %s2004_s21 = scalar_lea.vmem %s41_s13, 256  ;;  %p2009_p6 = scmp.lt.s32.totalorder %s41_s13, %s41_s13 }
  0x2c   :  { %p2005_p5 = scmp.ne.s32.totalorder %s41_s13, %s2004_s21  ;;  %p2010_p7 = scmp.lt.s32.totalorder %s2004_s21, %s2004_s21 }
  0x2e   :  { %p2011_p8 = por %p2010_p7, %p2009_p6 }
  0x30   :  { %p2012_p9 = pnand %p2011_p8, %p2005_p5 }
  0x32   :  { %2015 = shalt.err (!%p2012_p9)
}
  0x33   :  { %46 = dma.hbm_to_vmem [thread:$0]  %s2150_s2, 256, %s41_s13, [#allocation6], %s2048_s1, %s2048_s1, %s2049_s9  }
  0x34   :  { %2038 = dma.done.wait [#allocation3], 1024  }
  0x35   :  { %2039 = vsyncadd [#allocation3], 4294966272 }
  0x36   :  { %2040 = dma.done.wait [#allocation6], 7424  }
  0x37   :  { %2041 = vsyncadd [#allocation6], 4294959872  ;;  %v1884_v0 = vld [vmem:[#allocation5] sm:$0xff]   ;;  %v1885_v1 = vld [vmem:[#allocation5 + $0x8] sm:$0xff]   ;;  %s2051_s2 = smov 32  }
  0x38   :  { %1651 = vmatprep.subr.bf16.mxu0 %v1884_v0  ;;  %v1886_v2 = vld [vmem:[#allocation5 + $0x10] sm:$0xff]   ;;  %v1887_v3 = vld [vmem:[#allocation5 + $0x18] sm:$0xff]   ;;  %v57_v4 = vld [vmem:[#allocation2] sm:$0xff] }
  0x39   :  { %1652 = vmatpush3.bf16.msra.mxu0 %v1884_v0  ;;  %v58_v5 = vld [vmem:[#allocation2 + $0x8] sm:$0xff]  ;;  %v1888_v7 = vld [vmem:[#allocation5 + $0x20] sm:$0xff]   ;;  %v1890_v9 = vld [vmem:[#allocation5 + $0x30] sm:$0xff]  }
  0x3a   :  { %1653 = vmatprep.subr.bf16.mxu0 %v1885_v1  ;;  %v65_v6 = vpack.c.bf16 %v58_v5, %v57_v4  ;;  %v1889_v8 = vld [vmem:[#allocation5 + $0x28] sm:$0xff]   ;;  %v1891_v10 = vld [vmem:[#allocation5 + $0x38] sm:$0xff]   ;;  %v59_v11 = vld [vmem:[#allocation2 + $0x10] sm:$0xff] }
  0x3b   :  { %v60_v12 = vld [vmem:[#allocation2 + $0x18] sm:$0xff]  ;;  %v61_v13 = vld [vmem:[#allocation2 + $0x20] sm:$0xff]  ;;  %v62_v14 = vld [vmem:[#allocation2 + $0x28] sm:$0xff] }
  0x3c   :  { %1667 = vmatprep.mubr.bf16.mxu0 %v65_v6  ;;  %v66_v15 = vpack.c.bf16 %v60_v12, %v59_v11  ;;  %v67_v16 = vpack.c.bf16 %v62_v14, %v61_v13  ;;  %v63_v17 = vld [vmem:[#allocation2 + $0x30] sm:$0xff]  ;;  %v64_v18 = vld [vmem:[#allocation2 + $0x38] sm:$0xff]  ;;  %v1892_v20 = vld [vmem:[#allocation5 + $0x40] sm:$0xff]   ;;  %v245_v12 = vlaneseq }
  0x3d   :  { %1654 = vmatpush3.bf16.msra.mxu0 %v1885_v1  ;;  %v68_v19 = vpack.c.bf16 %v64_v18, %v63_v17  ;;  %1675 = vmatprep.subr.bf16.mxu1 %v1892_v20  ;;  %v1893_v21 = vld [vmem:[#allocation5 + $0x48] sm:$0xff]   ;;  %v1894_v22 = vld [vmem:[#allocation5 + $0x50] sm:$0xff]   ;;  %v1895_v23 = vld [vmem:[#allocation5 + $0x58] sm:$0xff]  }
  0x3e   :  { %1655 = vmatprep.subr.bf16.mxu0 %v1886_v2  ;;  %1676 = vmatpush3.bf16.msra.mxu1 %v1892_v20  ;;  %v1896_v24 = vld [vmem:[#allocation5 + $0x60] sm:$0xff]   ;;  %v1897_v25 = vld [vmem:[#allocation5 + $0x68] sm:$0xff]   ;;  %v1898_v26 = vld [vmem:[#allocation5 + $0x70] sm:$0xff]   ;;  %v246_v13 = vshrl.u32 %v245_v12, 7 }
  0x3f   :  { %1677 = vmatprep.subr.bf16.mxu1 %v1893_v21  ;;  %v1899_v27 = vld [vmem:[#allocation5 + $0x78] sm:$0xff]   ;;  %v198_v14 = vld [vmem:[#allocation7] sm:$0x1]  ;;  %v199_v18 = vld [vmem:[#allocation7 + $0x5] sm:$0x1] }
  0x41   :  { %1656 = vmatpush3.bf16.msra.mxu0 %v1886_v2 }
  0x42   :  { %1657 = vmatprep.subr.bf16.mxu0 %v1887_v3  ;;  %1678 = vmatpush3.bf16.msra.mxu1 %v1893_v21 }
  0x43   :  { %1679 = vmatprep.subr.bf16.mxu1 %v1894_v22 }
  0x45   :  { %1658 = vmatpush3.bf16.msra.mxu0 %v1887_v3 }
  0x46   :  { %1659 = vmatprep.subr.bf16.mxu0 %v1888_v7  ;;  %1680 = vmatpush3.bf16.msra.mxu1 %v1894_v22 }
  0x47   :  { %1681 = vmatprep.subr.bf16.mxu1 %v1895_v23 }
  0x49   :  { %1660 = vmatpush3.bf16.msra.mxu0 %v1888_v7 }
  0x4a   :  { %1661 = vmatprep.subr.bf16.mxu0 %v1889_v8  ;;  %1682 = vmatpush3.bf16.msra.mxu1 %v1895_v23 }
  0x4b   :  { %1683 = vmatprep.subr.bf16.mxu1 %v1896_v24 }
  0x4d   :  { %1662 = vmatpush3.bf16.msra.mxu0 %v1889_v8 }
  0x4e   :  { %1663 = vmatprep.subr.bf16.mxu0 %v1890_v9  ;;  %1684 = vmatpush3.bf16.msra.mxu1 %v1896_v24 }
  0x4f   :  { %1685 = vmatprep.subr.bf16.mxu1 %v1897_v25 }
  0x51   :  { %1664 = vmatpush3.bf16.msra.mxu0 %v1890_v9 }
  0x52   :  { %1665 = vmatprep.subr.bf16.mxu0 %v1891_v10  ;;  %1686 = vmatpush3.bf16.msra.mxu1 %v1897_v25 }
  0x53   :  { %1687 = vmatprep.subr.bf16.mxu1 %v1898_v26 }
  0x55   :  { %1666 = vmatpush3.bf16.msra.mxu0 %v1891_v10 }
  0x56   :  { %1688 = vmatpush3.bf16.msra.mxu1 %v1898_v26 }
  0x57   :  { %1689 = vmatprep.subr.bf16.mxu1 %v1899_v27 }
  0x58   :  { %1668 = vmatmul.mubr.bf16.vlgmr.msra.gmra.mrb[0].mxu0 %v66_v15  ;;  %v2117_v15 = vsub.s32 0, %v246_v13 }
  0x59   :  { %1671 = vmatprep.mubr.bf16.mxu0 %v67_v16 }
  0x5a   :  { %1690 = vmatpush3.bf16.msra.mxu1 %v1899_v27 }
  0x60   :  { %1672 = vmatmul.mubr.bf16.gmra.mrb[4].mxu0 %v68_v19 }
 0x12b   :  { %v1669_v28 = vpop.f32.mrb[0].mxu0 }
 0x12c   :  { %v167_v29 = vpop.f32.mrb[1].mxu0  ;;  %v217_v35 = vmul.f32 %v1669_v28, %v1669_v28 }
 0x12d   :  { %v1670_v30 = vpop.f32.mrb[2].mxu0  ;;  %v215_v32 = vmul.f32 %v167_v29, %v167_v29 }
 0x12e   :  { %v170_v31 = vpop.f32.mrb[3].mxu0  ;;  %v218_v38 = vmul.f32 %v1670_v30, %v1670_v30 }
 0x12f   :  { %v200_v33 = vadd.f32 %v170_v31, %v167_v29  ;;  %v216_v34 = vmul.f32 %v170_v31, %v170_v31 }
 0x131   :  { %v201_v36 = vadd.f32 %v1669_v28, %v200_v33  ;;  %v223_v37 = vadd.f32 %v216_v34, %v215_v32 }
 0x133   :  { %v224_v39 = vadd.f32 %v223_v37, %v217_v35  ;;  %v1673_v40 = vpop.f32.mrb[4].mxu0  ;;  %v202_v41 = vadd.f32 %v1670_v30, %v201_v36 }
 0x134   :  { %v183_v42 = vpop.f32.mrb[5].mxu0  ;;  %v221_v51 = vmul.f32 %v1673_v40, %v1673_v40 }
 0x135   :  { %v203_v43 = vadd.f32 %v202_v41, %v183_v42  ;;  %v219_v44 = vmul.f32 %v183_v42, %v183_v42  ;;  %v225_v45 = vadd.f32 %v224_v39, %v218_v38  ;;  %v1674_v46 = vpop.f32.mrb[6].mxu0 }
 0x136   :  { %v186_v47 = vpop.f32.mrb[7].mxu0  ;;  %v222_v54 = vmul.f32 %v1674_v46, %v1674_v46 }
 0x137   :  { %v226_v48 = vadd.f32 %v225_v45, %v219_v44  ;;  %v204_v49 = vadd.f32 %v203_v43, %v186_v47  ;;  %v220_v50 = vmul.f32 %v186_v47, %v186_v47 }
 0x139   :  { %v205_v52 = vadd.f32 %v1673_v40, %v204_v49  ;;  %v227_v53 = vadd.f32 %v226_v48, %v220_v50 }
 0x13b   :  { %v206_v55 = vadd.f32 %v1674_v46, %v205_v52  ;;  %v228_v56 = vadd.f32 %v227_v53, %v221_v51  ;;  %v1900_v51 = vld [vmem:[#allocation5 + $0x80] sm:$0xff]   ;;  %v1901_v52 = vld [vmem:[#allocation5 + $0x88] sm:$0xff]   ;;  %v1902_v53 = vld [vmem:[#allocation5 + $0x90] sm:$0xff]  }
 0x13c   :  { %1699 = vmatprep.subr.bf16.mxu0 %v1900_v51 }
 0x13d   :  { %v207_v57 = vrot.slane %v206_v55, 4  ;;  %v229_v58 = vadd.f32 %v228_v56, %v222_v54  ;;  %1700 = vmatpush3.bf16.msra.mxu0 %v1900_v51  ;;  %v1903_v54 = vld [vmem:[#allocation5 + $0x98] sm:$0xff]   ;;  %v1905_v56 = vld [vmem:[#allocation5 + $0xa8] sm:$0xff]  }
 0x13e   :  { %1701 = vmatprep.subr.bf16.mxu0 %v1901_v52 }
 0x13f   :  { %v208_v59 = vadd.f32 %v207_v57, %v206_v55  ;;  %v230_v60 = vrot.slane %v229_v58, 4  ;;  %v1904_v55 = vld [vmem:[#allocation5 + $0xa0] sm:$0xff]   ;;  %v1906_v57 = vld [vmem:[#allocation5 + $0xb0] sm:$0xff]  }
 0x141   :  { %v209_v61 = vrot.slane %v208_v59, 2  ;;  %v231_v62 = vadd.f32 %v230_v60, %v229_v58  ;;  %1702 = vmatpush3.bf16.msra.mxu0 %v1901_v52  ;;  %v1907_v58 = vld [vmem:[#allocation5 + $0xb8] sm:$0xff]  }
 0x142   :  { %1703 = vmatprep.subr.bf16.mxu0 %v1902_v53 }
 0x143   :  { %v210_v63 = vadd.f32 %v209_v61, %v208_v59  ;;  %v232_v0 = vrot.slane %v231_v62, 2 }
 0x145   :  { %v211_v1 = vrot.slane %v210_v63, 1  ;;  %v233_v2 = vadd.f32 %v232_v0, %v231_v62  ;;  %1704 = vmatpush3.bf16.msra.mxu0 %v1902_v53 }
 0x146   :  { %1705 = vmatprep.subr.bf16.mxu0 %v1903_v54 }
 0x147   :  { %v212_v3 = vadd.f32 %v211_v1, %v210_v63  ;;  %v234_v4 = vrot.slane %v233_v2, 1 }
 0x149   :  { %v214_v5 = vmul.f32 0.015625, %v212_v3  ;;  %v235_v6 = vadd.f32 %v234_v4, %v233_v2  ;;  %1706 = vmatpush3.bf16.msra.mxu0 %v1903_v54 }
 0x14a   :  { %1707 = vmatprep.subr.bf16.mxu0 %v1904_v55 }
 0x14b   :  { %v236_v7 = vmul.f32 0.015625, %v235_v6  ;;  %v237_v8 = vmul.f32 %v214_v5, %v214_v5 }
 0x14d   :  { %v238_v9 = vsub.f32 %v236_v7, %v237_v8  ;;  %1708 = vmatpush3.bf16.msra.mxu0 %v1904_v55 }
 0x14e   :  { %1709 = vmatprep.subr.bf16.mxu0 %v1905_v56 }
 0x14f   :  { %v239_v10 = vmax.f32 %v238_v9, 0.0 }
 0x151   :  { %v240_v11 = vadd.f32 1e-05, %v239_v10  ;;  %1710 = vmatpush3.bf16.msra.mxu0 %v1905_v56 }
 0x152   :  { %1711 = vmatprep.subr.bf16.mxu0 %v1906_v57 }
 0x153   :  { %1940 = vrsqrt.f32 %v240_v11 }
 0x155   :  { %1712 = vmatpush3.bf16.msra.mxu0 %v1906_v57 }
 0x156   :  { %1713 = vmatprep.subr.bf16.mxu0 %v1907_v58 }
 0x159   :  { %1714 = vmatpush3.bf16.msra.mxu0 %v1907_v58 }
 0x15d   :  { %v1941_v16 = vpop.eup %1940 }
 0x15e   :  { %v242_v17 = vmul.f32 %v1941_v16, %v198_v14 }
 0x160   :  { %v243_v19 = vmul.f32 %v242_v17, %v214_v5  ;;  %v248_v20 = vrot.slane %v242_v17, %v2117_v15 }
 0x162   :  { %v244_v21 = vsub.f32 %v199_v18, %v243_v19  ;;  %v254_v22 = vmul.f32 %v248_v20, %v186_v47  ;;  %v249_v23 = vmul.f32 %v248_v20, %v167_v29  ;;  %v250_v24 = vmul.f32 %v248_v20, %v170_v31 }
 0x163   :  { %v251_v25 = vmul.f32 %v1669_v28, %v248_v20  ;;  %v252_v26 = vmul.f32 %v1670_v30, %v248_v20  ;;  %v253_v27 = vmul.f32 %v248_v20, %v183_v42  ;;  %v255_v32 = vmul.f32 %v1673_v40, %v248_v20 }
 0x164   :  { %v260_v33 = vrot.slane %v244_v21, %v2117_v15  ;;  %v256_v34 = vmul.f32 %v1674_v46, %v248_v20 }
 0x166   :  { %v266_v35 = vadd.f32 %v260_v33, %v254_v22  ;;  %v261_v36 = vadd.f32 %v260_v33, %v249_v23  ;;  %v262_v37 = vadd.f32 %v260_v33, %v250_v24  ;;  %v263_v38 = vadd.f32 %v260_v33, %v251_v25 }
 0x167   :  { %v264_v39 = vadd.f32 %v260_v33, %v252_v26  ;;  %v265_v41 = vadd.f32 %v260_v33, %v253_v27  ;;  %v267_v43 = vadd.f32 %v260_v33, %v255_v32  ;;  %v268_v44 = vadd.f32 %v260_v33, %v256_v34 }
 0x168   :  { %v269_v45 = vmax.f32 %v261_v36, 0.0  ;;  %v270_v48 = vmax.f32 %v262_v37, 0.0  ;;  %v271_v47 = vmax.f32 %v263_v38, 0.0  ;;  %v274_v29 = vmax.f32 %v266_v35, 0.0 }
 0x169   :  { %v272_v31 = vmax.f32 %v264_v39, 0.0  ;;  %v273_v28 = vmax.f32 %v265_v41, 0.0  ;;  %v275_v30 = vmax.f32 %v267_v43, 0.0  ;;  %v276_v42 = vmax.f32 %v268_v44, 0.0 }
 0x16a   :  { %v277_v40 = vpack.c.bf16 %v270_v48, %v269_v45 }
 0x16b   :  { %v278_v49 = vpack.c.bf16 %v272_v31, %v271_v47  ;;  %v279_v50 = vpack.c.bf16 %v274_v29, %v273_v28  ;;  %v280_v46 = vpack.c.bf16 %v276_v42, %v275_v30  ;;  %v411_v28 = vld [vmem:[#allocation7 + $0x1] sm:$0x1] }
 0x16c   :  { %1691 = vmatprep.mubr.bf16.mxu1 %v277_v40  ;;  %v412_v40 = vld [vmem:[#allocation7 + $0x6] sm:$0x1] }
 0x16d   :  { %1692 = vmatmul.mubr.bf16.vlgmr.msra.gmra.mrb[0].mxu1 %v278_v49 }
 0x16e   :  { %1695 = vmatprep.mubr.bf16.mxu1 %v279_v50 }
 0x175   :  { %1696 = vmatmul.mubr.bf16.gmra.mrb[4].mxu1 %v280_v46 }
 0x240   :  { %v1693_v59 = vpop.f32.mrb[0].mxu1 }
 0x241   :  { %v380_v60 = vpop.f32.mrb[1].mxu1  ;;  %v429_v2 = vmul.f32 %v1693_v59, %v1693_v59 }
 0x242   :  { %v1694_v61 = vpop.f32.mrb[2].mxu1  ;;  %v427_v63 = vmul.f32 %v380_v60, %v380_v60 }
 0x243   :  { %v383_v62 = vpop.f32.mrb[3].mxu1  ;;  %v430_v5 = vmul.f32 %v1694_v61, %v1694_v61 }
 0x244   :  { %v413_v0 = vadd.f32 %v383_v62, %v380_v60  ;;  %v428_v1 = vmul.f32 %v383_v62, %v383_v62 }
 0x246   :  { %v414_v3 = vadd.f32 %v1693_v59, %v413_v0  ;;  %v435_v4 = vadd.f32 %v428_v1, %v427_v63 }
 0x248   :  { %v436_v6 = vadd.f32 %v435_v4, %v429_v2  ;;  %v1697_v7 = vpop.f32.mrb[4].mxu1  ;;  %v415_v8 = vadd.f32 %v1694_v61, %v414_v3 }
 0x249   :  { %v396_v9 = vpop.f32.mrb[5].mxu1  ;;  %v433_v19 = vmul.f32 %v1697_v7, %v1697_v7 }
 0x24a   :  { %v416_v10 = vadd.f32 %v415_v8, %v396_v9  ;;  %v431_v11 = vmul.f32 %v396_v9, %v396_v9  ;;  %v437_v12 = vadd.f32 %v436_v6, %v430_v5  ;;  %v1698_v13 = vpop.f32.mrb[6].mxu1 }
 0x24b   :  { %v399_v14 = vpop.f32.mrb[7].mxu1  ;;  %v434_v22 = vmul.f32 %v1698_v13, %v1698_v13 }
 0x24c   :  { %v438_v16 = vadd.f32 %v437_v12, %v431_v11  ;;  %v417_v17 = vadd.f32 %v416_v10, %v399_v14  ;;  %v432_v18 = vmul.f32 %v399_v14, %v399_v14 }
 0x24e   :  { %v418_v20 = vadd.f32 %v1697_v7, %v417_v17  ;;  %v439_v21 = vadd.f32 %v438_v16, %v432_v18  ;;  %v1908_v17 = vld [vmem:[#allocation5 + $0xc0] sm:$0xff]   ;;  %v1909_v18 = vld [vmem:[#allocation5 + $0xc8] sm:$0xff]  }
 0x24f   :  { %1723 = vmatprep.subr.bf16.mxu1 %v1908_v17 }
 0x250   :  { %v419_v23 = vadd.f32 %v1698_v13, %v418_v20  ;;  %v440_v24 = vadd.f32 %v439_v21, %v433_v19  ;;  %1724 = vmatpush3.bf16.msra.mxu1 %v1908_v17  ;;  %v1910_v19 = vld [vmem:[#allocation5 + $0xd0] sm:$0xff]   ;;  %v1911_v20 = vld [vmem:[#allocation5 + $0xd8] sm:$0xff]   ;;  %v1912_v21 = vld [vmem:[#allocation5 + $0xe0] sm:$0xff]  }
 0x251   :  { %1725 = vmatprep.subr.bf16.mxu1 %v1909_v18 }
 0x252   :  { %v420_v25 = vrot.slane %v419_v23, 4  ;;  %v441_v26 = vadd.f32 %v440_v24, %v434_v22  ;;  %v1913_v22 = vld [vmem:[#allocation5 + $0xe8] sm:$0xff]   ;;  %v1915_v24 = vld [vmem:[#allocation5 + $0xf8] sm:$0xff]  }
 0x254   :  { %v421_v27 = vadd.f32 %v420_v25, %v419_v23  ;;  %v442_v32 = vrot.slane %v441_v26, 4  ;;  %1726 = vmatpush3.bf16.msra.mxu1 %v1909_v18  ;;  %v1914_v23 = vld [vmem:[#allocation5 + $0xf0] sm:$0xff]  }
 0x255   :  { %1727 = vmatprep.subr.bf16.mxu1 %v1910_v19 }
 0x256   :  { %v422_v33 = vrot.slane %v421_v27, 2  ;;  %v443_v34 = vadd.f32 %v442_v32, %v441_v26 }
 0x258   :  { %v423_v35 = vadd.f32 %v422_v33, %v421_v27  ;;  %v444_v36 = vrot.slane %v443_v34, 2  ;;  %1728 = vmatpush3.bf16.msra.mxu1 %v1910_v19 }
 0x259   :  { %1729 = vmatprep.subr.bf16.mxu1 %v1911_v20 }
 0x25a   :  { %v424_v37 = vrot.slane %v423_v35, 1  ;;  %v445_v38 = vadd.f32 %v444_v36, %v443_v34 }
 0x25c   :  { %v425_v39 = vadd.f32 %v424_v37, %v423_v35  ;;  %v446_v41 = vrot.slane %v445_v38, 1  ;;  %1730 = vmatpush3.bf16.msra.mxu1 %v1911_v20 }
 0x25d   :  { %1731 = vmatprep.subr.bf16.mxu1 %v1912_v21 }
 0x25e   :  { %v426_v43 = vmul.f32 0.015625, %v425_v39  ;;  %v447_v44 = vadd.f32 %v446_v41, %v445_v38 }
 0x260   :  { %v448_v45 = vmul.f32 0.015625, %v447_v44  ;;  %v449_v48 = vmul.f32 %v426_v43, %v426_v43  ;;  %1732 = vmatpush3.bf16.msra.mxu1 %v1912_v21 }
 0x261   :  { %1733 = vmatprep.subr.bf16.mxu1 %v1913_v22 }
 0x262   :  { %v450_v47 = vsub.f32 %v448_v45, %v449_v48 }
 0x264   :  { %v451_v29 = vmax.f32 %v450_v47, 0.0  ;;  %1734 = vmatpush3.bf16.msra.mxu1 %v1913_v22 }
 0x265   :  { %1735 = vmatprep.subr.bf16.mxu1 %v1914_v23 }
 0x266   :  { %v452_v31 = vadd.f32 1e-05, %v451_v29 }
 0x268   :  { %1942 = vrsqrt.f32 %v452_v31  ;;  %1736 = vmatpush3.bf16.msra.mxu1 %v1914_v23 }
 0x269   :  { %1737 = vmatprep.subr.bf16.mxu1 %v1915_v24 }
 0x26c   :  { %1738 = vmatpush3.bf16.msra.mxu1 %v1915_v24 }
 0x272   :  { %v1943_v30 = vpop.eup %1942 }
 0x273   :  { %v454_v42 = vmul.f32 %v1943_v30, %v411_v28 }
 0x275   :  { %v455_v49 = vmul.f32 %v454_v42, %v426_v43  ;;  %v460_v50 = vrot.slane %v454_v42, %v2117_v15 }
 0x277   :  { %v456_v46 = vsub.f32 %v412_v40, %v455_v49  ;;  %v466_v51 = vmul.f32 %v460_v50, %v399_v14  ;;  %v461_v52 = vmul.f32 %v460_v50, %v380_v60  ;;  %v462_v53 = vmul.f32 %v460_v50, %v383_v62 }
 0x278   :  { %v463_v54 = vmul.f32 %v1693_v59, %v460_v50  ;;  %v464_v55 = vmul.f32 %v1694_v61, %v460_v50  ;;  %v465_v56 = vmul.f32 %v460_v50, %v396_v9  ;;  %v467_v57 = vmul.f32 %v1697_v7, %v460_v50 }
 0x279   :  { %v472_v58 = vrot.slane %v456_v46, %v2117_v15  ;;  %v468_v63 = vmul.f32 %v1698_v13, %v460_v50 }
 0x27b   :  { %v478_v0 = vadd.f32 %v472_v58, %v466_v51  ;;  %v473_v1 = vadd.f32 %v472_v58, %v461_v52  ;;  %v474_v2 = vadd.f32 %v472_v58, %v462_v53  ;;  %v475_v3 = vadd.f32 %v472_v58, %v463_v54 }
 0x27c   :  { %v476_v4 = vadd.f32 %v472_v58, %v464_v55  ;;  %v477_v5 = vadd.f32 %v472_v58, %v465_v56  ;;  %v479_v6 = vadd.f32 %v472_v58, %v467_v57  ;;  %v480_v8 = vadd.f32 %v472_v58, %v468_v63 }
 0x27d   :  { %v481_v10 = vmax.f32 %v473_v1, 0.0  ;;  %v482_v11 = vmax.f32 %v474_v2, 0.0  ;;  %v483_v12 = vmax.f32 %v475_v3, 0.0  ;;  %v486_v60 = vmax.f32 %v478_v0, 0.0 }
 0x27e   :  { %v484_v62 = vmax.f32 %v476_v4, 0.0  ;;  %v485_v59 = vmax.f32 %v477_v5, 0.0  ;;  %v487_v61 = vmax.f32 %v479_v6, 0.0  ;;  %v488_v9 = vmax.f32 %v480_v8, 0.0 }
 0x27f   :  { %v489_v7 = vpack.c.bf16 %v482_v11, %v481_v10 }
 0x280   :  { %v490_v14 = vpack.c.bf16 %v484_v62, %v483_v12  ;;  %v491_v16 = vpack.c.bf16 %v486_v60, %v485_v59  ;;  %v492_v13 = vpack.c.bf16 %v488_v9, %v487_v61  ;;  %v623_v59 = vld [vmem:[#allocation7 + $0x2] sm:$0x1] }
 0x281   :  { %1715 = vmatprep.mubr.bf16.mxu0 %v489_v7  ;;  %v624_v7 = vld [vmem:[#allocation7 + $0x7] sm:$0x1] }
 0x282   :  { %1716 = vmatmul.mubr.bf16.vlgmr.msra.gmra.mrb[8].mxu0 %v490_v14 }
 0x283   :  { %1719 = vmatprep.mubr.bf16.mxu0 %v491_v16 }
 0x28a   :  { %1720 = vmatmul.mubr.bf16.gmra.mrb[12].mxu0 %v492_v13 }
 0x355   :  { %v1717_v25 = vpop.f32.mrb[8].mxu0 }
 0x356   :  { %v592_v26 = vpop.f32.mrb[9].mxu0  ;;  %v641_v36 = vmul.f32 %v1717_v25, %v1717_v25 }
 0x357   :  { %v1718_v27 = vpop.f32.mrb[10].mxu0  ;;  %v639_v33 = vmul.f32 %v592_v26, %v592_v26 }
 0x358   :  { %v595_v32 = vpop.f32.mrb[11].mxu0  ;;  %v642_v39 = vmul.f32 %v1718_v27, %v1718_v27 }
 0x359   :  { %v625_v34 = vadd.f32 %v595_v32, %v592_v26  ;;  %v640_v35 = vmul.f32 %v595_v32, %v595_v32 }
 0x35b   :  { %v626_v37 = vadd.f32 %v1717_v25, %v625_v34  ;;  %v647_v38 = vadd.f32 %v640_v35, %v639_v33 }
 0x35d   :  { %v648_v41 = vadd.f32 %v647_v38, %v641_v36  ;;  %v1721_v43 = vpop.f32.mrb[12].mxu0  ;;  %v627_v44 = vadd.f32 %v1718_v27, %v626_v37 }
 0x35e   :  { %v608_v45 = vpop.f32.mrb[13].mxu0  ;;  %v645_v49 = vmul.f32 %v1721_v43, %v1721_v43 }
 0x35f   :  { %v628_v48 = vadd.f32 %v627_v44, %v608_v45  ;;  %v643_v47 = vmul.f32 %v608_v45, %v608_v45  ;;  %v649_v29 = vadd.f32 %v648_v41, %v642_v39  ;;  %v1722_v31 = vpop.f32.mrb[14].mxu0 }
 0x360   :  { %v611_v28 = vpop.f32.mrb[15].mxu0  ;;  %v646_v51 = vmul.f32 %v1722_v31, %v1722_v31 }
 0x361   :  { %v650_v30 = vadd.f32 %v649_v29, %v643_v47  ;;  %v629_v42 = vadd.f32 %v628_v48, %v611_v28  ;;  %v644_v40 = vmul.f32 %v611_v28, %v611_v28 }
 0x363   :  { %v630_v50 = vadd.f32 %v1721_v43, %v629_v42  ;;  %v651_v46 = vadd.f32 %v650_v30, %v644_v40  ;;  %v1916_v42 = vld [vmem:[#allocation5 + $0x100] sm:$0xff]   ;;  %v1917_v40 = vld [vmem:[#allocation5 + $0x108] sm:$0xff]  }
 0x364   :  { %1747 = vmatprep.subr.bf16.mxu0 %v1916_v42 }
 0x365   :  { %v631_v52 = vadd.f32 %v1722_v31, %v630_v50  ;;  %v652_v53 = vadd.f32 %v651_v46, %v645_v49  ;;  %1748 = vmatpush3.bf16.msra.mxu0 %v1916_v42  ;;  %v1918_v49 = vld [vmem:[#allocation5 + $0x110] sm:$0xff]   ;;  %v1919_v50 = vld [vmem:[#allocation5 + $0x118] sm:$0xff]   ;;  %v1920_v46 = vld [vmem:[#allocation5 + $0x120] sm:$0xff]  }
 0x366   :  { %1749 = vmatprep.subr.bf16.mxu0 %v1917_v40 }
 0x367   :  { %v632_v54 = vrot.slane %v631_v52, 4  ;;  %v653_v55 = vadd.f32 %v652_v53, %v646_v51  ;;  %v1921_v51 = vld [vmem:[#allocation5 + $0x128] sm:$0xff]   ;;  %v1923_v53 = vld [vmem:[#allocation5 + $0x138] sm:$0xff]  }
 0x369   :  { %v633_v56 = vadd.f32 %v632_v54, %v631_v52  ;;  %v654_v57 = vrot.slane %v653_v55, 4  ;;  %1750 = vmatpush3.bf16.msra.mxu0 %v1917_v40  ;;  %v1922_v52 = vld [vmem:[#allocation5 + $0x130] sm:$0xff]  }
 0x36a   :  { %1751 = vmatprep.subr.bf16.mxu0 %v1918_v49 }
 0x36b   :  { %v634_v58 = vrot.slane %v633_v56, 2  ;;  %v655_v63 = vadd.f32 %v654_v57, %v653_v55 }
 0x36d   :  { %v635_v0 = vadd.f32 %v634_v58, %v633_v56  ;;  %v656_v1 = vrot.slane %v655_v63, 2  ;;  %1752 = vmatpush3.bf16.msra.mxu0 %v1918_v49 }
 0x36e   :  { %1753 = vmatprep.subr.bf16.mxu0 %v1919_v50 }
 0x36f   :  { %v636_v2 = vrot.slane %v635_v0, 1  ;;  %v657_v3 = vadd.f32 %v656_v1, %v655_v63 }
 0x371   :  { %v637_v4 = vadd.f32 %v636_v2, %v635_v0  ;;  %v658_v5 = vrot.slane %v657_v3, 1  ;;  %1754 = vmatpush3.bf16.msra.mxu0 %v1919_v50 }
 0x372   :  { %1755 = vmatprep.subr.bf16.mxu0 %v1920_v46 }
 0x373   :  { %v638_v6 = vmul.f32 0.015625, %v637_v4  ;;  %v659_v8 = vadd.f32 %v658_v5, %v657_v3 }
 0x375   :  { %v660_v10 = vmul.f32 0.015625, %v659_v8  ;;  %v661_v11 = vmul.f32 %v638_v6, %v638_v6  ;;  %1756 = vmatpush3.bf16.msra.mxu0 %v1920_v46 }
 0x376   :  { %1757 = vmatprep.subr.bf16.mxu0 %v1921_v51 }
 0x377   :  { %v662_v12 = vsub.f32 %v660_v10, %v661_v11 }
 0x379   :  { %v663_v60 = vmax.f32 %v662_v12, 0.0  ;;  %1758 = vmatpush3.bf16.msra.mxu0 %v1921_v51 }
 0x37a   :  { %1759 = vmatprep.subr.bf16.mxu0 %v1922_v52 }
 0x37b   :  { %v664_v62 = vadd.f32 1e-05, %v663_v60 }
 0x37d   :  { %1944 = vrsqrt.f32 %v664_v62  ;;  %1760 = vmatpush3.bf16.msra.mxu0 %v1922_v52 }
 0x37e   :  { %1761 = vmatprep.subr.bf16.mxu0 %v1923_v53 }
 0x381   :  { %1762 = vmatpush3.bf16.msra.mxu0 %v1923_v53 }
 0x387   :  { %v1945_v61 = vpop.eup %1944 }
 0x388   :  { %v666_v9 = vmul.f32 %v1945_v61, %v623_v59 }
 0x38a   :  { %v667_v14 = vmul.f32 %v666_v9, %v638_v6  ;;  %v672_v16 = vrot.slane %v666_v9, %v2117_v15 }
 0x38c   :  { %v668_v13 = vsub.f32 %v624_v7, %v667_v14  ;;  %v678_v17 = vmul.f32 %v672_v16, %v611_v28  ;;  %v673_v18 = vmul.f32 %v672_v16, %v592_v26  ;;  %v674_v19 = vmul.f32 %v672_v16, %v595_v32 }
 0x38d   :  { %v675_v20 = vmul.f32 %v1717_v25, %v672_v16  ;;  %v676_v21 = vmul.f32 %v1718_v27, %v672_v16  ;;  %v677_v22 = vmul.f32 %v672_v16, %v608_v45  ;;  %v679_v23 = vmul.f32 %v1721_v43, %v672_v16 }
 0x38e   :  { %v684_v24 = vrot.slane %v668_v13, %v2117_v15  ;;  %v680_v33 = vmul.f32 %v1722_v31, %v672_v16 }
 0x390   :  { %v690_v34 = vadd.f32 %v684_v24, %v678_v17  ;;  %v685_v35 = vadd.f32 %v684_v24, %v673_v18  ;;  %v686_v36 = vadd.f32 %v684_v24, %v674_v19  ;;  %v687_v37 = vadd.f32 %v684_v24, %v675_v20 }
 0x391   :  { %v688_v38 = vadd.f32 %v684_v24, %v676_v21  ;;  %v689_v39 = vadd.f32 %v684_v24, %v677_v22  ;;  %v691_v41 = vadd.f32 %v684_v24, %v679_v23  ;;  %v692_v44 = vadd.f32 %v684_v24, %v680_v33 }
 0x392   :  { %v693_v48 = vmax.f32 %v685_v35, 0.0  ;;  %v694_v47 = vmax.f32 %v686_v36, 0.0  ;;  %v695_v29 = vmax.f32 %v687_v37, 0.0  ;;  %v698_v26 = vmax.f32 %v690_v34, 0.0 }
 0x393   :  { %v696_v32 = vmax.f32 %v688_v38, 0.0  ;;  %v697_v25 = vmax.f32 %v689_v39, 0.0  ;;  %v699_v27 = vmax.f32 %v691_v41, 0.0  ;;  %v700_v45 = vmax.f32 %v692_v44, 0.0 }
 0x394   :  { %v701_v43 = vpack.c.bf16 %v694_v47, %v693_v48 }
 0x395   :  { %v702_v28 = vpack.c.bf16 %v696_v32, %v695_v29  ;;  %v703_v30 = vpack.c.bf16 %v698_v26, %v697_v25  ;;  %v704_v31 = vpack.c.bf16 %v700_v45, %v699_v27  ;;  %v835_v25 = vld [vmem:[#allocation7 + $0x3] sm:$0x1] }
 0x396   :  { %1739 = vmatprep.mubr.bf16.mxu1 %v701_v43  ;;  %v836_v43 = vld [vmem:[#allocation7 + $0x8] sm:$0x1] }
 0x397   :  { %1740 = vmatmul.mubr.bf16.vlgmr.msra.gmra.mrb[8].mxu1 %v702_v28 }
 0x398   :  { %1743 = vmatprep.mubr.bf16.mxu1 %v703_v30 }
 0x39f   :  { %1744 = vmatmul.mubr.bf16.gmra.mrb[12].mxu1 %v704_v31 }
 0x46a   :  { %v1741_v54 = vpop.f32.mrb[8].mxu1 }
 0x46b   :  { %v804_v55 = vpop.f32.mrb[9].mxu1  ;;  %v853_v1 = vmul.f32 %v1741_v54, %v1741_v54 }
 0x46c   :  { %v1742_v56 = vpop.f32.mrb[10].mxu1  ;;  %v851_v58 = vmul.f32 %v804_v55, %v804_v55 }
 0x46d   :  { %v807_v57 = vpop.f32.mrb[11].mxu1  ;;  %v854_v4 = vmul.f32 %v1742_v56, %v1742_v56 }
 0x46e   :  { %v837_v63 = vadd.f32 %v807_v57, %v804_v55  ;;  %v852_v0 = vmul.f32 %v807_v57, %v807_v57 }
 0x470   :  { %v838_v2 = vadd.f32 %v1741_v54, %v837_v63  ;;  %v859_v3 = vadd.f32 %v852_v0, %v851_v58 }
 0x472   :  { %v860_v5 = vadd.f32 %v859_v3, %v853_v1  ;;  %v1745_v6 = vpop.f32.mrb[12].mxu1  ;;  %v839_v8 = vadd.f32 %v1742_v56, %v838_v2 }
 0x473   :  { %v820_v10 = vpop.f32.mrb[13].mxu1  ;;  %v857_v14 = vmul.f32 %v1745_v6, %v1745_v6 }
 0x474   :  { %v840_v11 = vadd.f32 %v839_v8, %v820_v10  ;;  %v855_v12 = vmul.f32 %v820_v10, %v820_v10  ;;  %v861_v60 = vadd.f32 %v860_v5, %v854_v4  ;;  %v1746_v62 = vpop.f32.mrb[14].mxu1 }
 0x475   :  { %v823_v59 = vpop.f32.mrb[15].mxu1  ;;  %v858_v17 = vmul.f32 %v1746_v62, %v1746_v62 }
 0x476   :  { %v862_v61 = vadd.f32 %v861_v60, %v855_v12  ;;  %v841_v9 = vadd.f32 %v840_v11, %v823_v59  ;;  %v856_v7 = vmul.f32 %v823_v59, %v823_v59 }
 0x478   :  { %v842_v16 = vadd.f32 %v1745_v6, %v841_v9  ;;  %v863_v13 = vadd.f32 %v862_v61, %v856_v7 }
 0x47a   :  { %v843_v18 = vadd.f32 %v1746_v62, %v842_v16  ;;  %v864_v19 = vadd.f32 %v863_v13, %v857_v14 }
 0x47c   :  { %v844_v20 = vrot.slane %v843_v18, 4  ;;  %v865_v21 = vadd.f32 %v864_v19, %v858_v17 }
 0x47e   :  { %v845_v22 = vadd.f32 %v844_v20, %v843_v18  ;;  %v866_v23 = vrot.slane %v865_v21, 4 }
 0x480   :  { %v846_v24 = vrot.slane %v845_v22, 2  ;;  %v867_v33 = vadd.f32 %v866_v23, %v865_v21 }
 0x482   :  { %v847_v34 = vadd.f32 %v846_v24, %v845_v22  ;;  %v868_v35 = vrot.slane %v867_v33, 2 }
 0x484   :  { %v848_v36 = vrot.slane %v847_v34, 1  ;;  %v869_v37 = vadd.f32 %v868_v35, %v867_v33 }
 0x486   :  { %v849_v38 = vadd.f32 %v848_v36, %v847_v34  ;;  %v870_v39 = vrot.slane %v869_v37, 1 }
 0x488   :  { %v850_v41 = vmul.f32 0.015625, %v849_v38  ;;  %v871_v44 = vadd.f32 %v870_v39, %v869_v37 }
 0x48a   :  { %v872_v48 = vmul.f32 0.015625, %v871_v44  ;;  %v873_v47 = vmul.f32 %v850_v41, %v850_v41 }
 0x48c   :  { %v874_v29 = vsub.f32 %v872_v48, %v873_v47 }
 0x48e   :  { %v875_v26 = vmax.f32 %v874_v29, 0.0 }
 0x490   :  { %v876_v32 = vadd.f32 1e-05, %v875_v26 }
 0x492   :  { %1946 = vrsqrt.f32 %v876_v32 }
 0x49c   :  { %v1947_v27 = vpop.eup %1946 }
 0x49d   :  { %v878_v45 = vmul.f32 %v1947_v27, %v835_v25 }
 0x49f   :  { %v879_v28 = vmul.f32 %v878_v45, %v850_v41  ;;  %v884_v30 = vrot.slane %v878_v45, %v2117_v15 }
 0x4a1   :  { %v880_v31 = vsub.f32 %v836_v43, %v879_v28  ;;  %v890_v42 = vmul.f32 %v884_v30, %v823_v59  ;;  %v885_v40 = vmul.f32 %v884_v30, %v804_v55  ;;  %v886_v49 = vmul.f32 %v884_v30, %v807_v57 }
 0x4a2   :  { %v887_v50 = vmul.f32 %v1741_v54, %v884_v30  ;;  %v888_v46 = vmul.f32 %v1742_v56, %v884_v30  ;;  %v889_v51 = vmul.f32 %v884_v30, %v820_v10  ;;  %v891_v52 = vmul.f32 %v1745_v6, %v884_v30 }
 0x4a3   :  { %v896_v53 = vrot.slane %v880_v31, %v2117_v15  ;;  %v892_v58 = vmul.f32 %v1746_v62, %v884_v30 }
 0x4a5   :  { %v902_v63 = vadd.f32 %v896_v53, %v890_v42  ;;  %v897_v0 = vadd.f32 %v896_v53, %v885_v40  ;;  %v898_v1 = vadd.f32 %v896_v53, %v886_v49  ;;  %v899_v2 = vadd.f32 %v896_v53, %v887_v50 }
 0x4a6   :  { %v900_v3 = vadd.f32 %v896_v53, %v888_v46  ;;  %v901_v4 = vadd.f32 %v896_v53, %v889_v51  ;;  %v903_v5 = vadd.f32 %v896_v53, %v891_v52  ;;  %v904_v8 = vadd.f32 %v896_v53, %v892_v58 }
 0x4a7   :  { %v905_v11 = vmax.f32 %v897_v0, 0.0  ;;  %v906_v12 = vmax.f32 %v898_v1, 0.0  ;;  %v907_v60 = vmax.f32 %v899_v2, 0.0  ;;  %v910_v55 = vmax.f32 %v902_v63, 0.0 }
 0x4a8   :  { %v908_v57 = vmax.f32 %v900_v3, 0.0  ;;  %v909_v54 = vmax.f32 %v901_v4, 0.0  ;;  %v911_v56 = vmax.f32 %v903_v5, 0.0  ;;  %v912_v10 = vmax.f32 %v904_v8, 0.0  ;;  %v1047_v4 = vld [vmem:[#allocation7 + $0x4] sm:$0x1] }
 0x4a9   :  { %v913_v6 = vpack.c.bf16 %v906_v12, %v905_v11  ;;  %v1048_v11 = vld [vmem:[#allocation7 + $0x9] sm:$0x1] }
 0x4aa   :  { %v914_v59 = vpack.c.bf16 %v908_v57, %v907_v60  ;;  %v915_v61 = vpack.c.bf16 %v910_v55, %v909_v54  ;;  %v916_v62 = vpack.c.bf16 %v912_v10, %v911_v56 }
 0x4ab   :  { %1763 = vmatprep.mubr.bf16.mxu0 %v913_v6 }
 0x4ac   :  { %1764 = vmatmul.mubr.bf16.vlgmr.msra.gmra.mrb[16].mxu0 %v914_v59 }
 0x4ad   :  { %1767 = vmatprep.mubr.bf16.mxu0 %v915_v61 }
 0x4b4   :  { %1768 = vmatmul.mubr.bf16.gmra.mrb[20].mxu0 %v916_v62 }
 0x57f   :  { %v1765_v9 = vpop.f32.mrb[16].mxu0 }
 0x580   :  { %v1016_v7 = vpop.f32.mrb[17].mxu0  ;;  %v1065_v19 = vmul.f32 %v1765_v9, %v1765_v9 }
 0x581   :  { %v1766_v14 = vpop.f32.mrb[18].mxu0  ;;  %v1063_v13 = vmul.f32 %v1016_v7, %v1016_v7 }
 0x582   :  { %v1019_v16 = vpop.f32.mrb[19].mxu0  ;;  %v1066_v22 = vmul.f32 %v1766_v14, %v1766_v14 }
 0x583   :  { %v1049_v17 = vadd.f32 %v1019_v16, %v1016_v7  ;;  %v1064_v18 = vmul.f32 %v1019_v16, %v1019_v16 }
 0x585   :  { %v1050_v20 = vadd.f32 %v1765_v9, %v1049_v17  ;;  %v1071_v21 = vadd.f32 %v1064_v18, %v1063_v13 }
 0x587   :  { %v1072_v23 = vadd.f32 %v1071_v21, %v1065_v19  ;;  %v1769_v24 = vpop.f32.mrb[20].mxu0  ;;  %v1051_v33 = vadd.f32 %v1766_v14, %v1050_v20 }
 0x588   :  { %v1032_v34 = vpop.f32.mrb[21].mxu0  ;;  %v1069_v47 = vmul.f32 %v1769_v24, %v1769_v24 }
 0x589   :  { %v1052_v35 = vadd.f32 %v1051_v33, %v1032_v34  ;;  %v1067_v36 = vmul.f32 %v1032_v34, %v1032_v34  ;;  %v1073_v37 = vadd.f32 %v1072_v23, %v1066_v22  ;;  %v1770_v38 = vpop.f32.mrb[22].mxu0 }
 0x58a   :  { %v1035_v39 = vpop.f32.mrb[23].mxu0  ;;  %v1070_v32 = vmul.f32 %v1770_v38, %v1770_v38 }
 0x58b   :  { %v1074_v41 = vadd.f32 %v1073_v37, %v1067_v36  ;;  %v1053_v44 = vadd.f32 %v1052_v35, %v1035_v39  ;;  %v1068_v48 = vmul.f32 %v1035_v39, %v1035_v39  ;;  %v1929_v37 = vld [vmem:[#allocation5 + $0x168] sm:$0xff]  }
 0x58d   :  { %v1054_v29 = vadd.f32 %v1769_v24, %v1053_v44  ;;  %v1075_v26 = vadd.f32 %v1074_v41, %v1068_v48  ;;  %v1931_v44 = vld [vmem:[#allocation5 + $0x178] sm:$0xff]  }
 0x58f   :  { %v1055_v25 = vadd.f32 %v1770_v38, %v1054_v29  ;;  %v1076_v27 = vadd.f32 %v1075_v26, %v1069_v47 }
 0x591   :  { %v1056_v45 = vrot.slane %v1055_v25, 4  ;;  %v1077_v43 = vadd.f32 %v1076_v27, %v1070_v32 }
 0x593   :  { %v1057_v28 = vadd.f32 %v1056_v45, %v1055_v25  ;;  %v1078_v30 = vrot.slane %v1077_v43, 4 }
 0x595   :  { %v1058_v31 = vrot.slane %v1057_v28, 2  ;;  %v1079_v42 = vadd.f32 %v1078_v30, %v1077_v43 }
 0x597   :  { %v1059_v40 = vadd.f32 %v1058_v31, %v1057_v28  ;;  %v1080_v49 = vrot.slane %v1079_v42, 2 }
 0x599   :  { %v1060_v50 = vrot.slane %v1059_v40, 1  ;;  %v1081_v46 = vadd.f32 %v1080_v49, %v1079_v42 }
 0x59b   :  { %v1061_v51 = vadd.f32 %v1060_v50, %v1059_v40  ;;  %v1082_v52 = vrot.slane %v1081_v46, 1 }
 0x59d   :  { %v1062_v53 = vmul.f32 0.015625, %v1061_v51  ;;  %v1083_v58 = vadd.f32 %v1082_v52, %v1081_v46 }
 0x59f   :  { %v1084_v63 = vmul.f32 0.015625, %v1083_v58  ;;  %v1085_v0 = vmul.f32 %v1062_v53, %v1062_v53 }
 0x5a1   :  { %v1086_v1 = vsub.f32 %v1084_v63, %v1085_v0  ;;  %v1932_v63 = vld [vmem:[#allocation5 + $0x180] sm:$0xff]   ;;  %v1933_v0 = vld [vmem:[#allocation5 + $0x188] sm:$0xff]  }
 0x5a2   :  { %1795 = vmatprep.subr.bf16.mxu0 %v1932_v63 }
 0x5a3   :  { %v1087_v2 = vmax.f32 %v1086_v1, 0.0  ;;  %1796 = vmatpush3.bf16.msra.mxu0 %v1932_v63 }
 0x5a4   :  { %1797 = vmatprep.subr.bf16.mxu0 %v1933_v0 }
 0x5a5   :  { %v1088_v3 = vadd.f32 1e-05, %v1087_v2  ;;  %v1934_v2 = vld [vmem:[#allocation5 + $0x190] sm:$0xff]  }
 0x5a7   :  { %1948 = vrsqrt.f32 %v1088_v3  ;;  %1798 = vmatpush3.bf16.msra.mxu0 %v1933_v0  ;;  %v1935_v3 = vld [vmem:[#allocation5 + $0x198] sm:$0xff]  }
 0x5a8   :  { %1799 = vmatprep.subr.bf16.mxu0 %v1934_v2 }
 0x5ab   :  { %1800 = vmatpush3.bf16.msra.mxu0 %v1934_v2 }
 0x5ac   :  { %1801 = vmatprep.subr.bf16.mxu0 %v1935_v3 }
 0x5af   :  { %1802 = vmatpush3.bf16.msra.mxu0 %v1935_v3 }
 0x5b1   :  { %v1949_v5 = vpop.eup %1948 }
 0x5b2   :  { %v1090_v8 = vmul.f32 %v1949_v5, %v1047_v4  ;;  %v1936_v4 = vld [vmem:[#allocation5 + $0x1a0] sm:$0xff]   ;;  %v1937_v5 = vld [vmem:[#allocation5 + $0x1a8] sm:$0xff]  }
 0x5b3   :  { %1803 = vmatprep.subr.bf16.mxu0 %v1936_v4 }
 0x5b4   :  { %v1091_v12 = vmul.f32 %v1090_v8, %v1062_v53  ;;  %v1096_v60 = vrot.slane %v1090_v8, %v2117_v15  ;;  %1804 = vmatpush3.bf16.msra.mxu0 %v1936_v4 }
 0x5b5   :  { %1805 = vmatprep.subr.bf16.mxu0 %v1937_v5 }
 0x5b6   :  { %v1092_v55 = vsub.f32 %v1048_v11, %v1091_v12  ;;  %v1102_v57 = vmul.f32 %v1096_v60, %v1035_v39  ;;  %v1101_v54 = vmul.f32 %v1096_v60, %v1032_v34  ;;  %v1097_v56 = vmul.f32 %v1096_v60, %v1016_v7  ;;  %v1924_v7 = vld [vmem:[#allocation5 + $0x140] sm:$0xff]  }
 0x5b7   :  { %v1098_v10 = vmul.f32 %v1096_v60, %v1019_v16  ;;  %v1103_v6 = vmul.f32 %v1769_v24, %v1096_v60  ;;  %v1104_v59 = vmul.f32 %v1770_v38, %v1096_v60  ;;  %v1099_v61 = vmul.f32 %v1765_v9, %v1096_v60  ;;  %v1925_v24 = vld [vmem:[#allocation5 + $0x148] sm:$0xff]   ;;  %1771 = vmatprep.subr.bf16.mxu1 %v1924_v7  ;;  %v1928_v34 = vld [vmem:[#allocation5 + $0x160] sm:$0xff]   ;;  %v1930_v38 = vld [vmem:[#allocation5 + $0x170] sm:$0xff]  }
 0x5b8   :  { %v1108_v62 = vrot.slane %v1092_v55, %v2117_v15  ;;  %v1100_v13 = vmul.f32 %v1766_v14, %v1096_v60  ;;  %1772 = vmatpush3.bf16.msra.mxu1 %v1924_v7  ;;  %v1926_v15 = vld [vmem:[#allocation5 + $0x150] sm:$0xff]   ;;  %v1927_v14 = vld [vmem:[#allocation5 + $0x158] sm:$0xff]   ;;  %1806 = vmatpush3.bf16.msra.mxu0 %v1937_v5 }
 0x5b9   :  { %1773 = vmatprep.subr.bf16.mxu1 %v1925_v24  ;;  %v1938_v7 = vld [vmem:[#allocation5 + $0x1b0] sm:$0xff]  }
 0x5ba   :  { %v1113_v17 = vadd.f32 %v1108_v62, %v1101_v54  ;;  %v1114_v18 = vadd.f32 %v1108_v62, %v1102_v57  ;;  %v1109_v19 = vadd.f32 %v1108_v62, %v1097_v56  ;;  %v1110_v20 = vadd.f32 %v1108_v62, %v1098_v10  ;;  %1807 = vmatprep.subr.bf16.mxu0 %v1938_v7 }
 0x5bb   :  { %v1115_v21 = vadd.f32 %v1108_v62, %v1103_v6  ;;  %v1116_v22 = vadd.f32 %v1108_v62, %v1104_v59  ;;  %v1111_v23 = vadd.f32 %v1108_v62, %v1099_v61  ;;  %v1112_v33 = vadd.f32 %v1108_v62, %v1100_v13 }
 0x5bc   :  { %v1854_v35 = vpack.i.bf16 %v1114_v18, %v1113_v17  ;;  %v1844_v36 = vpack.i.bf16 %v1110_v20, %v1109_v19  ;;  %1774 = vmatpush3.bf16.msra.mxu1 %v1925_v24  ;;  %1808 = vmatpush3.bf16.msra.mxu0 %v1938_v7 }
 0x5bd   :  { %v1859_v16 = vpack.i.bf16 %v1116_v22, %v1115_v21  ;;  %v1849_v9 = vpack.i.bf16 %v1112_v33, %v1111_v23  ;;  %1775 = vmatprep.subr.bf16.mxu1 %v1926_v15 }
 0x5be   :  { %1855 = vrot.lane.b32.xlu1 %v1854_v35, %s2045_s22  ;;  %1845 = vrot.lane.b32.xlu0 %v1844_v36, %s2045_s22 }
 0x5c0   :  { %1776 = vmatpush3.bf16.msra.mxu1 %v1926_v15 }
 0x5c1   :  { %1777 = vmatprep.subr.bf16.mxu1 %v1927_v14 }
 0x5c2   :  { %1860 = vrot.lane.b32.xlu1 %v1859_v16, %s2045_s22  ;;  %1850 = vrot.lane.b32.xlu0 %v1849_v9, %s2045_s22  ;;  %v1939_v16 = vld [vmem:[#allocation5 + $0x1b8] sm:$0xff]   ;;  %v1549_v9 = vld [vmem:[#allocation7 + $0xa] ss:$0 sm:$0xff]  ;;  %s2052_s22 = smov [#allocation8]  }
 0x5c3   :  { %1809 = vmatprep.subr.bf16.mxu0 %v1939_v16  ;;  %s1496_s24 = sshll.u32 %s2052_s22, 4  ;;  %s1497_s24 = int_to_ptr.vmem [resolvable:$true] %s1496_s24 }
 0x5c4   :  { %1778 = vmatpush3.bf16.msra.mxu1 %v1927_v14  ;;  %1810 = vmatpush3.bf16.msra.mxu0 %v1939_v16  ;;  %s2016_s25 = scalar_lea.vmem %s1497_s24, 1024  ;;  %p2021_p11 = scmp.lt.s32.totalorder %s1497_s24, %s1497_s24 }
 0x5c5   :  { %1779 = vmatprep.subr.bf16.mxu1 %v1928_v34  ;;  %p2017_p10 = scmp.ne.s32.totalorder %s1497_s24, %s2016_s25  ;;  %p2022_p12 = scmp.lt.s32.totalorder %s2016_s25, %s2016_s25 }
 0x5c7   :  { %p2023_p13 = por %p2022_p12, %p2021_p11 }
 0x5c8   :  { %1780 = vmatpush3.bf16.msra.mxu1 %v1928_v34 }
 0x5c9   :  { %1781 = vmatprep.subr.bf16.mxu1 %v1929_v37  ;;  %p2024_p0 = pnand %p2023_p13, %p2017_p10 }
 0x5cc   :  { %1782 = vmatpush3.bf16.msra.mxu1 %v1929_v37 }
 0x5cd   :  { %1783 = vmatprep.subr.bf16.mxu1 %v1930_v38 }
 0x5d0   :  { %1784 = vmatpush3.bf16.msra.mxu1 %v1930_v38 }
 0x5d1   :  { %1785 = vmatprep.subr.bf16.mxu1 %v1931_v44 }
 0x5d4   :  { %1786 = vmatpush3.bf16.msra.mxu1 %v1931_v44 }
 0x5d5   :  { %1819 = vmatprep.subr.bf16.mxu1 %v1932_v63 }
 0x630   :  { %v1856_v39 = vpop.permute.xlu1 %1855  ;;  %v1846_v41 = vpop.permute.xlu0 %1845 }
 0x631   :  { %v1848_v48 = vunpack.i.h.bf16 %v1846_v41  ;;  %v1847_v47 = vunpack.i.l.bf16 %v1846_v41  ;;  %v1858_v29 = vunpack.i.h.bf16 %v1856_v39  ;;  %v1857_v26 = vunpack.i.l.bf16 %v1856_v39 }
 0x633   :  { %v1150_v32 = vmax.f32 %v1110_v20, %v1848_v48  ;;  %v1149_v25 = vmax.f32 %v1109_v19, %v1847_v47  ;;  %v1154_v42 = vmax.f32 %v1114_v18, %v1858_v29  ;;  %v1153_v40 = vmax.f32 %v1113_v17, %v1857_v26 }
 0x634   :  { %v1861_v27 = vpop.permute.xlu1 %1860  ;;  %v1851_v45 = vpop.permute.xlu0 %1850 }
 0x635   :  { %v1863_v43 = vunpack.i.h.bf16 %v1861_v27  ;;  %v1862_v28 = vunpack.i.l.bf16 %v1861_v27  ;;  %v1853_v30 = vunpack.i.h.bf16 %v1851_v45  ;;  %v1852_v31 = vunpack.i.l.bf16 %v1851_v45 }
 0x636   :  { %v1864_v49 = vpack.i.bf16 %v1150_v32, %v1149_v25  ;;  %v1874_v58 = vpack.i.bf16 %v1154_v42, %v1153_v40 }
 0x637   :  { %v1152_v50 = vmax.f32 %v1112_v33, %v1853_v30  ;;  %v1151_v46 = vmax.f32 %v1111_v23, %v1852_v31  ;;  %v1156_v51 = vmax.f32 %v1116_v22, %v1863_v43  ;;  %v1155_v52 = vmax.f32 %v1115_v21, %v1862_v28 }
 0x638   :  { %1865 = vrot.lane.b32.xlu0 %v1864_v49, %s2051_s2 }
 0x639   :  { %v1869_v53 = vpack.i.bf16 %v1152_v50, %v1151_v46  ;;  %v1879_v1 = vpack.i.bf16 %v1156_v51, %v1155_v52 }
 0x63b   :  { %1870 = vrot.lane.b32.xlu1 %v1869_v53, %s2051_s2  ;;  %v1558_v53 = vld [vmem:[#allocation7 + $0xb] ss:$0 sm:$0xff] }
 0x63c   :  { %1875 = vrot.lane.b32.xlu0 %v1874_v58, %s2051_s2 }
 0x63f   :  { %1880 = vrot.lane.b32.xlu1 %v1879_v1, %s2051_s2 }
 0x6aa   :  { %v1866_v8 = vpop.permute.xlu0 %1865 }
 0x6ab   :  { %v1868_v11 = vunpack.i.h.bf16 %v1866_v8  ;;  %v1867_v12 = vunpack.i.l.bf16 %v1866_v8 }
 0x6ad   :  { %v1190_v60 = vmax.f32 %v1150_v32, %v1868_v11  ;;  %v1189_v55 = vmax.f32 %v1149_v25, %v1867_v12  ;;  %v1871_v57 = vpop.permute.xlu1 %1870 }
 0x6ae   :  { %v1873_v54 = vunpack.i.h.bf16 %v1871_v57  ;;  %v1872_v56 = vunpack.i.l.bf16 %v1871_v57  ;;  %v1876_v10 = vpop.permute.xlu0 %1875 }
 0x6af   :  { %v1878_v6 = vunpack.i.h.bf16 %v1876_v10  ;;  %v1877_v59 = vunpack.i.l.bf16 %v1876_v10  ;;  %v1197_v61 = vpack.c.bf16 %v1190_v60, %v1189_v55 }
 0x6b0   :  { %v1192_v62 = vmax.f32 %v1152_v50, %v1873_v54  ;;  %v1191_v13 = vmax.f32 %v1151_v46, %v1872_v56 }
 0x6b1   :  { %v1194_v17 = vmax.f32 %v1154_v42, %v1878_v6  ;;  %v1193_v18 = vmax.f32 %v1153_v40, %v1877_v59  ;;  %1787 = vmatprep.mubr.bf16.mxu1 %v1197_v61  ;;  %v1881_v19 = vpop.permute.xlu1 %1880 }
 0x6b2   :  { %v1198_v20 = vpack.c.bf16 %v1192_v62, %v1191_v13  ;;  %v1883_v21 = vunpack.i.h.bf16 %v1881_v19  ;;  %v1882_v22 = vunpack.i.l.bf16 %v1881_v19 }
 0x6b3   :  { %v1199_v23 = vpack.c.bf16 %v1194_v17, %v1193_v18 }
 0x6b4   :  { %1788 = vmatmul.mubr.bf16.vlgmr.msra.gmra.mrb[16].mxu1 %v1198_v20  ;;  %v1196_v33 = vmax.f32 %v1156_v51, %v1883_v21  ;;  %v1195_v35 = vmax.f32 %v1155_v52, %v1882_v22 }
 0x6b5   :  { %1791 = vmatprep.mubr.bf16.mxu1 %v1199_v23  ;;  %1827 = vmatpush3.bf16.msra.mxu1 %v1932_v63 }
 0x6b6   :  { %1820 = vmatprep.subr.bf16.mxu1 %v1933_v0  ;;  %v1200_v36 = vpack.c.bf16 %v1196_v33, %v1195_v35 }
 0x6b9   :  { %1828 = vmatpush3.bf16.msra.mxu1 %v1933_v0 }
 0x6ba   :  { %1821 = vmatprep.subr.bf16.mxu1 %v1934_v2 }
 0x6bc   :  { %1792 = vmatmul.mubr.bf16.gmra.mrb[20].mxu1 %v1200_v36 }
 0x6bd   :  { %1829 = vmatpush3.bf16.msra.mxu1 %v1934_v2 }
 0x6be   :  { %1822 = vmatprep.subr.bf16.mxu1 %v1935_v3 }
 0x6c1   :  { %1830 = vmatpush3.bf16.msra.mxu1 %v1935_v3 }
 0x6c2   :  { %1823 = vmatprep.subr.bf16.mxu1 %v1936_v4 }
 0x6c5   :  { %1831 = vmatpush3.bf16.msra.mxu1 %v1936_v4 }
 0x6c6   :  { %1824 = vmatprep.subr.bf16.mxu1 %v1937_v5 }
 0x6c9   :  { %1832 = vmatpush3.bf16.msra.mxu1 %v1937_v5 }
 0x6ca   :  { %1825 = vmatprep.subr.bf16.mxu1 %v1938_v7 }
 0x6cd   :  { %1833 = vmatpush3.bf16.msra.mxu1 %v1938_v7 }
 0x6ce   :  { %1826 = vmatprep.subr.bf16.mxu1 %v1939_v16 }
 0x6d1   :  { %1834 = vmatpush3.bf16.msra.mxu1 %v1939_v16 }
 0x787   :  { %v1789_v24 = vpop.f32.mrb[16].mxu1 }
 0x788   :  { %v1314_v15 = vadd.f32 %v1789_v24, %v1549_v9  ;;  %v1305_v14 = vpop.f32.mrb[17].mxu1 }
 0x789   :  { %v1306_v34 = vadd.f32 %v1549_v9, %v1305_v14  ;;  %v1790_v37 = vpop.f32.mrb[18].mxu1 }
 0x78a   :  { %v1317_v38 = vadd.f32 %v1790_v37, %v1549_v9  ;;  %v1308_v39 = vpop.f32.mrb[19].mxu1  ;;  %v1338_v44 = vmax.f32 %v1314_v15, 0.0 }
 0x78b   :  { %v1309_v41 = vadd.f32 %v1549_v9, %v1308_v39  ;;  %v1336_v47 = vmax.f32 %v1306_v34, 0.0 }
 0x78c   :  { %v1339_v48 = vmax.f32 %v1317_v38, 0.0 }
 0x78d   :  { %v1337_v29 = vmax.f32 %v1309_v41, 0.0 }
 0x78e   :  { %v1345_v26 = vpack.c.bf16 %v1339_v48, %v1338_v44 }
 0x78f   :  { %v1344_v32 = vpack.c.bf16 %v1337_v29, %v1336_v47  ;;  %v1793_v25 = vpop.f32.mrb[20].mxu1 }
 0x790   :  { %v1330_v27 = vadd.f32 %v1793_v25, %v1549_v9  ;;  %v1321_v45 = vpop.f32.mrb[21].mxu1 }
 0x791   :  { %v1322_v43 = vadd.f32 %v1549_v9, %v1321_v45  ;;  %v1794_v28 = vpop.f32.mrb[22].mxu1  ;;  %1811 = vmatprep.mubr.bf16.mxu0 %v1344_v32 }
 0x792   :  { %v1333_v30 = vadd.f32 %v1794_v28, %v1549_v9  ;;  %v1324_v31 = vpop.f32.mrb[23].mxu1  ;;  %1812 = vmatmul.mubr.bf16.vlgmr.msra.gmra.mrb[24].mxu0 %v1345_v26  ;;  %v1342_v40 = vmax.f32 %v1330_v27, 0.0 }
 0x793   :  { %v1325_v42 = vadd.f32 %v1549_v9, %v1324_v31  ;;  %v1340_v50 = vmax.f32 %v1322_v43, 0.0 }
 0x794   :  { %v1343_v49 = vmax.f32 %v1333_v30, 0.0 }
 0x795   :  { %v1341_v46 = vmax.f32 %v1325_v42, 0.0 }
 0x796   :  { %v1347_v51 = vpack.c.bf16 %v1343_v49, %v1342_v40 }
 0x797   :  { %v1346_v52 = vpack.c.bf16 %v1341_v46, %v1340_v50 }
 0x799   :  { %1815 = vmatprep.mubr.bf16.mxu1 %v1346_v52 }
 0x79a   :  { %1816 = vmatmul.mubr.bf16.vlgmr.msra.gmra.mrb[24].mxu1 %v1347_v51 }
 0x865   :  { %v1813_v58 = vpop.f32.mrb[24].mxu0 }
 0x866   :  { %v1461_v63 = vadd.f32 %v1813_v58, %v1558_v53  ;;  %v1452_v0 = vpop.f32.mrb[25].mxu0 }
 0x867   :  { %v1453_v1 = vadd.f32 %v1558_v53, %v1452_v0  ;;  %v1814_v2 = vpop.f32.mrb[26].mxu0 }
 0x868   :  { %1485 = vst [vmem:[#allocation8 + $0x10] sm:$0xff] %v1461_v63  ;;  %v1464_v3 = vadd.f32 %v1814_v2, %v1558_v53  ;;  %v1455_v4 = vpop.f32.mrb[27].mxu0 }
 0x869   :  { %1483 = vst [vmem:[#allocation8] sm:$0xff] %v1453_v1  ;;  %v1456_v5 = vadd.f32 %v1558_v53, %v1455_v4 }
 0x86a   :  { %1486 = vst [vmem:[#allocation8 + $0x18] sm:$0xff] %v1464_v3 }
 0x86b   :  { %1484 = vst [vmem:[#allocation8 + $0x8] sm:$0xff] %v1456_v5 }
 0x86d   :  { %v1817_v8 = vpop.f32.mrb[24].mxu1 }
 0x86e   :  { %v1477_v11 = vadd.f32 %v1817_v8, %v1558_v53  ;;  %v1468_v12 = vpop.f32.mrb[25].mxu1 }
 0x86f   :  { %v1469_v60 = vadd.f32 %v1558_v53, %v1468_v12  ;;  %v1818_v55 = vpop.f32.mrb[26].mxu1 }
 0x870   :  { %1489 = vst [vmem:[#allocation8 + $0x30] sm:$0xff] %v1477_v11  ;;  %v1480_v57 = vadd.f32 %v1818_v55, %v1558_v53  ;;  %v1471_v54 = vpop.f32.mrb[27].mxu1 }
 0x871   :  { %1487 = vst [vmem:[#allocation8 + $0x20] sm:$0xff] %v1469_v60  ;;  %v1472_v56 = vadd.f32 %v1558_v53, %v1471_v54 }
 0x872   :  { %1490 = vst [vmem:[#allocation8 + $0x38] sm:$0xff] %v1480_v57 }
 0x873   :  { %1488 = vst [vmem:[#allocation8 + $0x28] sm:$0xff] %v1472_v56 }
 0x874   :  { %2027 = shalt.err (!%p2024_p0)
}
 0x875   :  { %s2028_s28 = scalar_lea.hbm %s2151_s3, 1024 }
 0x876   :  { %p2029_p1 = scmp.ne.s32.totalorder %s2151_s3, %s2028_s28  ;;  %p2032_p2 = scmp.lt.u32.totalorder %s2028_s28, %s2151_s3 }
 0x878   :  { %p2034_p3 = pnand %p2032_p2, %p2029_p1 }
 0x87a   :  { %2037 = shalt.err (!%p2034_p3)
}
 0x87b   :  { %1502 = dma.vmem_to_hbm [thread:$0]  %s1497_s24, 1024, %s2151_s3, [#allocation4], %s2048_s1, %s2048_s1, %s2049_s9  }
 0x87c   :  { %2042 = dma.done.wait [#allocation4], 1024  }
 0x87d   :  { %2043 = vsyncadd [#allocation4], 4294966272 }
 0x87e   :  { %1506 = vsyncpa [#allocation3], 1 }
 0x87f   :  { %1507 = vsyncpa [#allocation6], 1 }
 0x880   :  { %1508 = vsyncpa [#allocation4], 1 }

</bundles_post_ra>
